<compile_context>
chip_gen: v5e
topology: v5e:2x2
jax: 0.10.0
libtpu: 0.0.40
codegen_flags: <defaults>
</compile_context>

<pallas_src>
import functools

import numpy as np
import jax
import jax.numpy as jnp
from jax.experimental import pallas as pl
from jax.experimental.pallas import tpu as pltpu


# ----------------------------------------------------------------------------
# Fused forward kernel: one batch element per grid step, all values 2-D.
# ----------------------------------------------------------------------------
def _fused_forward_kernel(*refs, L0, enc_cfg, dec_cfg, dot_dtype):
    f32 = jnp.float32
    n_enc, n_dec = len(enc_cfg), len(dec_cfg)

    idx = 0
    x_ref = refs[idx]; idx += 1                    # (L0+1, Cin0), row 0 == 0 (left pad)
    enc_p = []
    for _ in range(n_enc):
        enc_p.append((refs[idx], refs[idx + 1])); idx += 2
    dec_p = []
    for _ in range(n_dec):
        dec_p.append((refs[idx], refs[idx + 1], refs[idx + 2])); idx += 3
    out_e_ref, out_o_ref = refs[idx], refs[idx + 1]; idx += 2
    scratch = refs[idx:]                           # e1, e2, e3, latent, d0, d1, d2

    def mm(a, w_ref):
        return jnp.dot(a.astype(dot_dtype), w_ref[...].astype(dot_dtype),
                       preferred_element_type=f32)

    # ---- encoder: Conv1d(k=3, s=2, p=1) + ReLU, x4 --------------------------
    # y[t] = x[2t-1] @ W0 + x[2t] @ W1 + x[2t+1] @ W2 + b
    # src holds x at rows 1..Li with row 0 == 0, so all three windows are plain
    # stride-2 row reads (row 0 supplies the left zero pad at t == 0).
    src, Li = x_ref, L0
    for i, (cin, cout) in enumerate(enc_cfg):
        w_ref, b_ref = enc_p[i]
        Lo = Li // 2
        x_p = src[pl.ds(0, Lo, 2), :]              # x[2t-1]
        x_e = src[pl.ds(1, Lo, 2), :]              # x[2t]
        x_o = src[pl.ds(2, Lo, 2), :]              # x[2t+1]
        if cin == 1:
            w = w_ref[...]                         # (3, cout), f32 -> VPU broadcast path
            y = x_p * w[0:1, :] + x_e * w[1:2, :] + x_o * w[2:3, :] + b_ref[...]
        else:
            cat = jnp.concatenate([x_p, x_e, x_o], axis=-1)     # (Lo, 3*cin)
            y = mm(cat, w_ref) + b_ref[...]                     # one MXU pass / layer
        h = jnp.maximum(y, 0.0)                                  # (Lo, cout), f32
        dst = scratch[i]
        if i < n_enc - 1:
            dst[0:1, :] = jnp.zeros((1, cout), f32)              # leading zero pad row
            dst[1:Lo + 1, :] = h
        else:
            dst[0:Lo, :] = h                                     # latent: trailing pad
            dst[Lo:Lo + 1, :] = jnp.zeros((1, cout), f32)        # (x[L] := 0)
        src, Li = dst, Lo

    # ---- decoder, both heads fused: ConvTranspose1d(k=3, s=2, p=1, op=1) x4 --
    # y[2t]   = x[t] @ W1                 + b
    # y[2t+1] = x[t] @ W2 + x[t+1] @ W0   + b        (x[Li] := 0)
    for i, (kin, cout2) in enumerate(dec_cfg):
        w1_ref, w20_ref, b_ref = dec_p[i]
        x_c = src[pl.ds(0, Li), :]                 # x[t]
        x_n = src[pl.ds(1, Li), :]                 # x[t+1] (last row is the zero pad)
        y_even = mm(x_c, w1_ref) + b_ref[...]
        y_odd = mm(jnp.concatenate([x_c, x_n], axis=-1), w20_ref) + b_ref[...]
        if i < n_dec - 1:
            y_even = jnp.maximum(y_even, 0.0)
            y_odd = jnp.maximum(y_odd, 0.0)
            Lo = 2 * Li
            dst = scratch[n_enc + i]               # (Lo+1, cout2), trailing zero row
            dst[pl.ds(0, Li, 2), :] = y_even       # rows 0, 2, ..., Lo-2
            dst[pl.ds(1, Li, 2), :] = y_odd        # rows 1, 3, ..., Lo-1
            dst[Lo:Lo + 1, :] = jnp.zeros((1, cout2), f32)
            src, Li = dst, Lo
        else:
            # sigmoid = exp (EUP) * approx reciprocal (EUP); stores are lane-dense
            # (channels, length) phase slabs.
            s_even = pl.reciprocal(1.0 + jnp.exp(-y_even), approx=True)
            s_odd = pl.reciprocal(1.0 + jnp.exp(-y_odd), approx=True)
            out_e_ref[...] = jnp.transpose(s_even, (1, 0))       # (2, L0//2)
            out_o_ref[...] = jnp.transpose(s_odd, (1, 0))


# ----------------------------------------------------------------------------
# Weight packing (plain JAX glue, tiny)
# ----------------------------------------------------------------------------
def _prepare_weights(params, dot_dtype, n_layers=4):
    flat, enc_cfg, dec_cfg = [], [], []
    for i in range(n_layers):
        w = jnp.asarray(params[f"enc{i}_w"])                     # (cout, cin, 3)
        b = jnp.asarray(params[f"enc{i}_b"])
        cout, cin, _ = w.shape
        w_cat = jnp.concatenate([jnp.transpose(w[:, :, k]) for k in range(3)],
                                axis=0)                          # (3*cin, cout)
        flat.append(w_cat.astype(jnp.float32 if cin == 1 else dot_dtype))
        flat.append(b.reshape(1, cout).astype(jnp.float32))
        enc_cfg.append((cin, cout))

    for i in range(n_layers):
        ws = jnp.asarray(params[f"dec_s{i}_w"])                  # (cin, cout, 3)
        wn = jnp.asarray(params[f"dec_n{i}_w"])
        bs = jnp.asarray(params[f"dec_s{i}_b"])
        bn = jnp.asarray(params[f"dec_n{i}_b"])
        cin, cout, _ = ws.shape

        def fuse(k, first=(i == 0), ws=ws, wn=wn, cin=cin, cout=cout):
            if first:                                            # both heads read latent
                return jnp.concatenate([ws[:, :, k], wn[:, :, k]], axis=1)
            z = jnp.zeros((cin, cout), ws.dtype)                 # block-diag: heads apart
            return jnp.concatenate(
                [jnp.concatenate([ws[:, :, k], z], axis=1),
                 jnp.concatenate([z, wn[:, :, k]], axis=1)], axis=0)

        w1 = fuse(1)                                             # even phase weight
        w20 = jnp.concatenate([fuse(2), fuse(0)], axis=0)        # odd: [x|x_next] weight
        bias = jnp.concatenate([bs, bn]).reshape(1, 2 * cout)
        flat += [w1.astype(dot_dtype), w20.astype(dot_dtype), bias.astype(jnp.float32)]
        dec_cfg.append((w1.shape[0], 2 * cout))
    return flat, tuple(enc_cfg), tuple(dec_cfg)


# ----------------------------------------------------------------------------
# Full model forward (matches Conv1Ddenoise_large.forward)
# ----------------------------------------------------------------------------
def conv1ddenoise_forward(params, x_ncl, *, dot_dtype=jnp.float32):
    B, cin0, L0 = x_ncl.shape
    n_layers = 4
    assert L0 % (2 ** n_layers) == 0, "sequence length must be divisible by 16"
    # TODO(synk): for B == 1 with very long sequences, tile the grid along L
    # (with halo rows) instead of along B.

    flat, enc_cfg, dec_cfg = _prepare_weights(params, dot_dtype, n_layers)

    # channels-last + one leading zero row per sequence (= the conv left pad)
    x_cl = jnp.transpose(x_ncl, (0, 2, 1)).astype(jnp.float32)   # (B, L0, Cin)
    x_pad = jnp.pad(x_cl, ((0, 0), (1, 0), (0, 0)))              # (B, L0+1, Cin)

    # VMEM scratch: encoder activations (leading pad), latent + decoder (trailing pad)
    scratch = []
    L = L0
    for (_, cout) in enc_cfg:
        L //= 2
        scratch.append(pltpu.VMEM((L + 1, cout), jnp.float32))
    for (_, cout2) in dec_cfg[:-1]:
        L *= 2
        scratch.append(pltpu.VMEM((L + 1, cout2), jnp.float32))

    # real conv FLOPs only (no structural matmuls remain)
    flops = 0
    L = L0
    for cin, cout in enc_cfg:
        L //= 2
        flops += 2 * L * (3 * cin) * cout
    for kin, cout2 in dec_cfg:
        flops += 2 * L * kin * cout2 + 2 * L * (2 * kin) * cout2
        L *= 2
    flops *= B
    bytes_accessed = (4 * int(x_pad.size) + 4 * B * 2 * L0
                      + sum(int(a.size) * a.dtype.itemsize for a in flat))

    kernel = functools.partial(_fused_forward_kernel, L0=L0,
                               enc_cfg=enc_cfg, dec_cfg=dec_cfg,
                               dot_dtype=dot_dtype)

    in_specs = [pl.BlockSpec((None, L0 + 1, cin0), lambda i: (i, 0, 0))]
    in_specs += [pl.BlockSpec(a.shape, lambda i: (0, 0)) for a in flat]
    half = L0 // 2
    out_specs = (pl.BlockSpec((None, 2, half), lambda i: (i, 0, 0)),
                 pl.BlockSpec((None, 2, half), lambda i: (i, 0, 0)))
    out_shape = (jax.ShapeDtypeStruct((B, 2, half), jnp.float32),
                 jax.ShapeDtypeStruct((B, 2, half), jnp.float32))

    out_e, out_o = pl.pallas_call(
        kernel,
        grid=(B,),
        in_specs=in_specs,
        out_specs=out_specs,
        out_shape=out_shape,
        scratch_shapes=scratch,
        compiler_params=pltpu.CompilerParams(
            dimension_semantics=("parallel",)),
        cost_estimate=pl.CostEstimate(
            flops=int(flops),
            transcendentals=2 * B * 2 * L0,          # exp + reciprocal of the sigmoids
            bytes_accessed=int(bytes_accessed)),
    )(x_pad, *flat)

    # interleave the even/odd output phases back to full length (cheap XLA op)
    out = jnp.stack([out_e, out_o], axis=-1).reshape(B, 2, L0)
    rec, noise = out[:, 0, :], out[:, 1, :]
    return jnp.squeeze(rec), jnp.squeeze(noise)      # matches torch .squeeze()


# ----------------------------------------------------------------------------
# Deterministic parameter init (shapes from the module's __init__)
# ----------------------------------------------------------------------------
def init_params(latent_dim=128):
    params = {}
    keys = jax.random.split(jax.random.PRNGKey(0), 48)
    ki = 0
    enc_ch = [(1, 16), (16, 32), (32, 64), (64, latent_dim)]
    for i, (ci, co) in enumerate(enc_ch):
        params[f"enc{i}_w"] = 0.1 * jax.random.normal(keys[ki], (co, ci, 3), jnp.float32); ki += 1
        params[f"enc{i}_b"] = 0.05 * jax.random.normal(keys[ki], (co,), jnp.float32); ki += 1
    dec_ch = [(latent_dim, 64), (64, 32), (32, 16), (16, 1)]
    for prefix in ("dec_s", "dec_n"):
        for i, (ci, co) in enumerate(dec_ch):
            params[f"{prefix}{i}_w"] = 0.1 * jax.random.normal(keys[ki], (ci, co, 3), jnp.float32); ki += 1
            params[f"{prefix}{i}_b"] = 0.05 * jax.random.normal(keys[ki], (co,), jnp.float32); ki += 1
    return params


# ----------------------------------------------------------------------------
# Pure-numpy reference (direct PyTorch semantics) for correctness checking
# ----------------------------------------------------------------------------
def np_conv1d(x, w, b, stride=2, pad=1):
    B, Ci, L = x.shape
    Co, _, K = w.shape
    xp = np.pad(x, ((0, 0), (0, 0), (pad, pad)))
    Lout = (L + 2 * pad - K) // stride + 1
    y = np.zeros((B, Co, Lout), np.float32)
    for t in range(Lout):
        seg = xp[:, :, t * stride:t * stride + K]
        y[:, :, t] = np.einsum("bik,oik->bo", seg, w)
    return y + b[None, :, None]


def np_convt1d(x, w, b, stride=2, pad=1, outpad=1):
    B, Ci, L = x.shape
    _, Co, K = w.shape
    Lout = (L - 1) * stride - 2 * pad + K + outpad
    y = np.zeros((B, Co, Lout), np.float32)
    for s in range(L):
        for k in range(K):
            t = s * stride - pad + k
            if 0 <= t < Lout:
                y[:, :, t] += np.einsum("bi,io->bo", x[:, :, s], w[:, :, k])
    return y + b[None, :, None]


def np_forward(params, x_ncl):
    p = {k: np.asarray(v) for k, v in params.items()}
    relu = lambda z: np.maximum(z, 0.0)
    sigm = lambda z: 1.0 / (1.0 + np.exp(-z))
    h = np.asarray(x_ncl)
    for i in range(4):
        h = relu(np_conv1d(h, p[f"enc{i}_w"], p[f"enc{i}_b"]))
    latent = h

    def decode(prefix):
        z = latent
        for i in range(4):
            z = np_convt1d(z, p[f"{prefix}{i}_w"], p[f"{prefix}{i}_b"])
            z = sigm(z) if i == 3 else relu(z)
        return z

    rec = np.squeeze(decode("dec_s"))
    noise = np.squeeze(decode("dec_n"))
    return rec, noise


# ----------------------------------------------------------------------------
if __name__ == "__main__":
    B, C_in, L, latent_dim = 2, 1, 16, 128
    params = init_params(latent_dim)
    key_x = jax.random.PRNGKey(0)
    x = jax.random.uniform(key_x, (B, C_in, L), jnp.float32)

    rec_ref, noise_ref = np_forward(params, x)

    # f32-dot path (tight check; tolerance allows the approx-reciprocal sigmoid)
    fwd32 = jax.jit(functools.partial(conv1ddenoise_forward, dot_dtype=jnp.float32))
    rec, noise = fwd32(params, x)
    rec = jax.block_until_ready(rec)
    noise = jax.block_until_ready(noise)
    assert rec.shape == rec_ref.shape and noise.shape == noise_ref.shape
    np.testing.assert_allclose(np.asarray(rec), rec_ref, rtol=3e-3, atol=3e-3)
    np.testing.assert_allclose(np.asarray(noise), noise_ref, rtol=3e-3, atol=3e-3)

    # bf16-dot path (production MXU path; f32 accumulation) -- looser tolerance
    fwd16 = jax.jit(functools.partial(conv1ddenoise_forward, dot_dtype=jnp.bfloat16))
    rec16, noise16 = fwd16(params, x)
    rec16 = jax.block_until_ready(rec16)
    noise16 = jax.block_until_ready(noise16)
    np.testing.assert_allclose(np.asarray(rec16), rec_ref, rtol=3e-2, atol=3e-2)
    np.testing.assert_allclose(np.asarray(noise16), noise_ref, rtol=3e-2, atol=3e-2)

    print("KERNEL_OK")
</pallas_src>

<mosaic_0001>
module attributes {stable_mosaic.version = 11 : i64} {
  func.func @_fused_forward_kernel(%arg0: i32, %arg1: memref<1x17x1xf32, #tpu.memory_space<vmem>>, %arg2: memref<3x16xf32, #tpu.memory_space<vmem>>, %arg3: memref<1x16xf32, #tpu.memory_space<vmem>>, %arg4: memref<48x32xf32, #tpu.memory_space<vmem>>, %arg5: memref<1x32xf32, #tpu.memory_space<vmem>>, %arg6: memref<96x64xf32, #tpu.memory_space<vmem>>, %arg7: memref<1x64xf32, #tpu.memory_space<vmem>>, %arg8: memref<192x128xf32, #tpu.memory_space<vmem>>, %arg9: memref<1x128xf32, #tpu.memory_space<vmem>>, %arg10: memref<128x128xf32, #tpu.memory_space<vmem>>, %arg11: memref<256x128xf32, #tpu.memory_space<vmem>>, %arg12: memref<1x128xf32, #tpu.memory_space<vmem>>, %arg13: memref<128x64xf32, #tpu.memory_space<vmem>>, %arg14: memref<256x64xf32, #tpu.memory_space<vmem>>, %arg15: memref<1x64xf32, #tpu.memory_space<vmem>>, %arg16: memref<64x32xf32, #tpu.memory_space<vmem>>, %arg17: memref<128x32xf32, #tpu.memory_space<vmem>>, %arg18: memref<1x32xf32, #tpu.memory_space<vmem>>, %arg19: memref<32x2xf32, #tpu.memory_space<vmem>>, %arg20: memref<64x2xf32, #tpu.memory_space<vmem>>, %arg21: memref<1x2xf32, #tpu.memory_space<vmem>>, %arg22: memref<1x2x8xf32, #tpu.memory_space<vmem>>, %arg23: memref<1x2x8xf32, #tpu.memory_space<vmem>>, %arg24: memref<9x16xf32, #tpu.memory_space<vmem>>, %arg25: memref<5x32xf32, #tpu.memory_space<vmem>>, %arg26: memref<3x64xf32, #tpu.memory_space<vmem>>, %arg27: memref<2x128xf32, #tpu.memory_space<vmem>>, %arg28: memref<3x128xf32, #tpu.memory_space<vmem>>, %arg29: memref<5x64xf32, #tpu.memory_space<vmem>>, %arg30: memref<9x32xf32, #tpu.memory_space<vmem>>) attributes {dimension_semantics = [#tpu.dimension_semantics<parallel>], iteration_bounds = array<i64: 2>, scalar_prefetch = 0 : i64, scratch_operands = 7 : i64, tpu.core_type = #tpu.core_type<tc>, window_params = [{transform_indices = @transform_0, window_bounds = array<i64: 1, 17, 1>}, {pipeline_mode = #tpu.pipeline_mode<synchronous>, transform_indices = @transform_1, window_bounds = array<i64: 3, 16>}, {pipeline_mode = #tpu.pipeline_mode<synchronous>, transform_indices = @transform_2, window_bounds = array<i64: 1, 16>}, {pipeline_mode = #tpu.pipeline_mode<synchronous>, transform_indices = @transform_3, window_bounds = array<i64: 48, 32>}, {pipeline_mode = #tpu.pipeline_mode<synchronous>, transform_indices = @transform_4, window_bounds = array<i64: 1, 32>}, {pipeline_mode = #tpu.pipeline_mode<synchronous>, transform_indices = @transform_5, window_bounds = array<i64: 96, 64>}, {pipeline_mode = #tpu.pipeline_mode<synchronous>, transform_indices = @transform_6, window_bounds = array<i64: 1, 64>}, {pipeline_mode = #tpu.pipeline_mode<synchronous>, transform_indices = @transform_7, window_bounds = array<i64: 192, 128>}, {pipeline_mode = #tpu.pipeline_mode<synchronous>, transform_indices = @transform_8, window_bounds = array<i64: 1, 128>}, {pipeline_mode = #tpu.pipeline_mode<synchronous>, transform_indices = @transform_9, window_bounds = array<i64: 128, 128>}, {pipeline_mode = #tpu.pipeline_mode<synchronous>, transform_indices = @transform_10, window_bounds = array<i64: 256, 128>}, {pipeline_mode = #tpu.pipeline_mode<synchronous>, transform_indices = @transform_11, window_bounds = array<i64: 1, 128>}, {pipeline_mode = #tpu.pipeline_mode<synchronous>, transform_indices = @transform_12, window_bounds = array<i64: 128, 64>}, {pipeline_mode = #tpu.pipeline_mode<synchronous>, transform_indices = @transform_13, window_bounds = array<i64: 256, 64>}, {pipeline_mode = #tpu.pipeline_mode<synchronous>, transform_indices = @transform_14, window_bounds = array<i64: 1, 64>}, {pipeline_mode = #tpu.pipeline_mode<synchronous>, transform_indices = @transform_15, window_bounds = array<i64: 64, 32>}, {pipeline_mode = #tpu.pipeline_mode<synchronous>, transform_indices = @transform_16, window_bounds = array<i64: 128, 32>}, {pipeline_mode = #tpu.pipeline_mode<synchronous>, transform_indices = @transform_17, window_bounds = array<i64: 1, 32>}, {pipeline_mode = #tpu.pipeline_mode<synchronous>, transform_indices = @transform_18, window_bounds = array<i64: 32, 2>}, {pipeline_mode = #tpu.pipeline_mode<synchronous>, transform_indices = @transform_19, window_bounds = array<i64: 64, 2>}, {pipeline_mode = #tpu.pipeline_mode<synchronous>, transform_indices = @transform_20, window_bounds = array<i64: 1, 2>}, {transform_indices = @transform_21, window_bounds = array<i64: 1, 2, 8>}, {transform_indices = @transform_22, window_bounds = array<i64: 1, 2, 8>}]} {
    %c0 = arith.constant 0 : index
    %c0_0 = arith.constant 0 : index
    %c0_1 = arith.constant 0 : index
    %0 = tpu.strided_load %arg1[%c0, %c0_0, %c0_1] {strides = array<i32: 1, 2, 1>} : memref<1x17x1xf32, #tpu.memory_space<vmem>>, vector<1x8x1xf32>
    %1 = vector.shape_cast %0 : vector<1x8x1xf32> to vector<8x1xf32>
    %c0_2 = arith.constant 0 : index
    %c1 = arith.constant 1 : index
    %c0_3 = arith.constant 0 : index
    %2 = tpu.strided_load %arg1[%c0_2, %c1, %c0_3] {strides = array<i32: 1, 2, 1>} : memref<1x17x1xf32, #tpu.memory_space<vmem>>, vector<1x8x1xf32>
    %3 = vector.shape_cast %2 : vector<1x8x1xf32> to vector<8x1xf32>
    %c0_4 = arith.constant 0 : index
    %c2 = arith.constant 2 : index
    %c0_5 = arith.constant 0 : index
    %4 = tpu.strided_load %arg1[%c0_4, %c2, %c0_5] {strides = array<i32: 1, 2, 1>} : memref<1x17x1xf32, #tpu.memory_space<vmem>>, vector<1x8x1xf32>
    %5 = vector.shape_cast %4 : vector<1x8x1xf32> to vector<8x1xf32>
    %c0_6 = arith.constant 0 : index
    %c0_7 = arith.constant 0 : index
    %6 = vector.load %arg2[%c0_6, %c0_7] : memref<3x16xf32, #tpu.memory_space<vmem>>, vector<3x16xf32>
    %7 = vector.extract_strided_slice %6 {offsets = [0, 0], sizes = [1, 16], strides = [1, 1]} : vector<3x16xf32> to vector<1x16xf32>
    %8 = vector.broadcast %1 : vector<8x1xf32> to vector<8x16xf32>
    %9 = vector.broadcast %7 : vector<1x16xf32> to vector<8x16xf32>
    %10 = arith.mulf %8, %9 : vector<8x16xf32>
    %11 = vector.extract_strided_slice %6 {offsets = [1, 0], sizes = [1, 16], strides = [1, 1]} : vector<3x16xf32> to vector<1x16xf32>
    %12 = vector.broadcast %3 : vector<8x1xf32> to vector<8x16xf32>
    %13 = vector.broadcast %11 : vector<1x16xf32> to vector<8x16xf32>
    %14 = arith.mulf %12, %13 : vector<8x16xf32>
    %15 = arith.addf %10, %14 : vector<8x16xf32>
    %16 = vector.extract_strided_slice %6 {offsets = [2, 0], sizes = [1, 16], strides = [1, 1]} : vector<3x16xf32> to vector<1x16xf32>
    %17 = vector.broadcast %5 : vector<8x1xf32> to vector<8x16xf32>
    %18 = vector.broadcast %16 : vector<1x16xf32> to vector<8x16xf32>
    %19 = arith.mulf %17, %18 : vector<8x16xf32>
    %20 = arith.addf %15, %19 : vector<8x16xf32>
    %c0_8 = arith.constant 0 : index
    %c0_9 = arith.constant 0 : index
    %21 = vector.load %arg3[%c0_8, %c0_9] : memref<1x16xf32, #tpu.memory_space<vmem>>, vector<1x16xf32>
    %22 = vector.broadcast %21 : vector<1x16xf32> to vector<8x16xf32>
    %23 = arith.addf %20, %22 : vector<8x16xf32>
    %cst = arith.constant 0.000000e+00 : f32
    %24 = vector.broadcast %cst : f32 to vector<8x16xf32>
    %25 = arith.maximumf %23, %24 : vector<8x16xf32>
    %cst_10 = arith.constant 0.000000e+00 : f32
    %26 = vector.broadcast %cst_10 : f32 to vector<1x16xf32>
    %c0_11 = arith.constant 0 : index
    %c0_12 = arith.constant 0 : index
    %27 = vector.load %arg24[%c0_11, %c0_12] : memref<9x16xf32, #tpu.memory_space<vmem>>, vector<1x16xf32>
    tpu.vector_store %arg24[%c0_11, %c0_12], %26 {strides = array<i32>} : memref<9x16xf32, #tpu.memory_space<vmem>>, vector<1x16xf32>,
    %c1_13 = arith.constant 1 : index
    %c0_14 = arith.constant 0 : index
    %28 = vector.load %arg24[%c1_13, %c0_14] : memref<9x16xf32, #tpu.memory_space<vmem>>, vector<8x16xf32>
    tpu.vector_store %arg24[%c1_13, %c0_14], %25 {strides = array<i32>} : memref<9x16xf32, #tpu.memory_space<vmem>>, vector<8x16xf32>,
    %c0_15 = arith.constant 0 : index
    %c0_16 = arith.constant 0 : index
    %29 = tpu.strided_load %arg24[%c0_15, %c0_16] {strides = array<i32: 2, 1>} : memref<9x16xf32, #tpu.memory_space<vmem>>, vector<4x16xf32>
    %c1_17 = arith.constant 1 : index
    %c0_18 = arith.constant 0 : index
    %30 = tpu.strided_load %arg24[%c1_17, %c0_18] {strides = array<i32: 2, 1>} : memref<9x16xf32, #tpu.memory_space<vmem>>, vector<4x16xf32>
    %c2_19 = arith.constant 2 : index
    %c0_20 = arith.constant 0 : index
    %31 = tpu.strided_load %arg24[%c2_19, %c0_20] {strides = array<i32: 2, 1>} : memref<9x16xf32, #tpu.memory_space<vmem>>, vector<4x16xf32>
    %32 = tpu.concatenate %29, %30, %31 in 1 : vector<4x16xf32>, vector<4x16xf32>, vector<4x16xf32> -> vector<4x48xf32>
    %c0_21 = arith.constant 0 : index
    %c0_22 = arith.constant 0 : index
    %33 = vector.load %arg4[%c0_21, %c0_22] : memref<48x32xf32, #tpu.memory_space<vmem>>, vector<48x32xf32>
    %cst_23 = arith.constant dense<0.000000e+00> : vector<4x32xf32>
    %34 = tpu.matmul %32, %33, %cst_23 {dimension_numbers = #tpu.dot_dimension_numbers<[1], [0], [0], [1], [0, 0, 1, 1], [], []>} : vector<4x48xf32>, vector<48x32xf32>, vector<4x32xf32> -> vector<4x32xf32>
    %c0_24 = arith.constant 0 : index
    %c0_25 = arith.constant 0 : index
    %35 = vector.load %arg5[%c0_24, %c0_25] : memref<1x32xf32, #tpu.memory_space<vmem>>, vector<1x32xf32>
    %36 = vector.broadcast %35 : vector<1x32xf32> to vector<4x32xf32>
    %37 = arith.addf %34, %36 : vector<4x32xf32>
    %cst_26 = arith.constant 0.000000e+00 : f32
    %38 = vector.broadcast %cst_26 : f32 to vector<4x32xf32>
    %39 = arith.maximumf %37, %38 : vector<4x32xf32>
    %cst_27 = arith.constant 0.000000e+00 : f32
    %40 = vector.broadcast %cst_27 : f32 to vector<1x32xf32>
    %c0_28 = arith.constant 0 : index
    %c0_29 = arith.constant 0 : index
    %41 = vector.load %arg25[%c0_28, %c0_29] : memref<5x32xf32, #tpu.memory_space<vmem>>, vector<1x32xf32>
    tpu.vector_store %arg25[%c0_28, %c0_29], %40 {strides = array<i32>} : memref<5x32xf32, #tpu.memory_space<vmem>>, vector<1x32xf32>,
    %c1_30 = arith.constant 1 : index
    %c0_31 = arith.constant 0 : index
    %42 = vector.load %arg25[%c1_30, %c0_31] : memref<5x32xf32, #tpu.memory_space<vmem>>, vector<4x32xf32>
    tpu.vector_store %arg25[%c1_30, %c0_31], %39 {strides = array<i32>} : memref<5x32xf32, #tpu.memory_space<vmem>>, vector<4x32xf32>,
    %c0_32 = arith.constant 0 : index
    %c0_33 = arith.constant 0 : index
    %43 = tpu.strided_load %arg25[%c0_32, %c0_33] {strides = array<i32: 2, 1>} : memref<5x32xf32, #tpu.memory_space<vmem>>, vector<2x32xf32>
    %c1_34 = arith.constant 1 : index
    %c0_35 = arith.constant 0 : index
    %44 = tpu.strided_load %arg25[%c1_34, %c0_35] {strides = array<i32: 2, 1>} : memref<5x32xf32, #tpu.memory_space<vmem>>, vector<2x32xf32>
    %c2_36 = arith.constant 2 : index
    %c0_37 = arith.constant 0 : index
    %45 = tpu.strided_load %arg25[%c2_36, %c0_37] {strides = array<i32: 2, 1>} : memref<5x32xf32, #tpu.memory_space<vmem>>, vector<2x32xf32>
    %46 = tpu.concatenate %43, %44, %45 in 1 : vector<2x32xf32>, vector<2x32xf32>, vector<2x32xf32> -> vector<2x96xf32>
    %c0_38 = arith.constant 0 : index
    %c0_39 = arith.constant 0 : index
    %47 = vector.load %arg6[%c0_38, %c0_39] : memref<96x64xf32, #tpu.memory_space<vmem>>, vector<96x64xf32>
    %cst_40 = arith.constant dense<0.000000e+00> : vector<2x64xf32>
    %48 = tpu.matmul %46, %47, %cst_40 {dimension_numbers = #tpu.dot_dimension_numbers<[1], [0], [0], [1], [0, 0, 1, 1], [], []>} : vector<2x96xf32>, vector<96x64xf32>, vector<2x64xf32> -> vector<2x64xf32>
    %c0_41 = arith.constant 0 : index
    %c0_42 = arith.constant 0 : index
    %49 = vector.load %arg7[%c0_41, %c0_42] : memref<1x64xf32, #tpu.memory_space<vmem>>, vector<1x64xf32>
    %50 = vector.broadcast %49 : vector<1x64xf32> to vector<2x64xf32>
    %51 = arith.addf %48, %50 : vector<2x64xf32>
    %cst_43 = arith.constant 0.000000e+00 : f32
    %52 = vector.broadcast %cst_43 : f32 to vector<2x64xf32>
    %53 = arith.maximumf %51, %52 : vector<2x64xf32>
    %cst_44 = arith.constant 0.000000e+00 : f32
    %54 = vector.broadcast %cst_44 : f32 to vector<1x64xf32>
    %c0_45 = arith.constant 0 : index
    %c0_46 = arith.constant 0 : index
    %55 = vector.load %arg26[%c0_45, %c0_46] : memref<3x64xf32, #tpu.memory_space<vmem>>, vector<1x64xf32>
    tpu.vector_store %arg26[%c0_45, %c0_46], %54 {strides = array<i32>} : memref<3x64xf32, #tpu.memory_space<vmem>>, vector<1x64xf32>,
    %c1_47 = arith.constant 1 : index
    %c0_48 = arith.constant 0 : index
    %56 = vector.load %arg26[%c1_47, %c0_48] : memref<3x64xf32, #tpu.memory_space<vmem>>, vector<2x64xf32>
    tpu.vector_store %arg26[%c1_47, %c0_48], %53 {strides = array<i32>} : memref<3x64xf32, #tpu.memory_space<vmem>>, vector<2x64xf32>,
    %c0_49 = arith.constant 0 : index
    %c0_50 = arith.constant 0 : index
    %57 = tpu.strided_load %arg26[%c0_49, %c0_50] {strides = array<i32: 2, 1>} : memref<3x64xf32, #tpu.memory_space<vmem>>, vector<1x64xf32>
    %c1_51 = arith.constant 1 : index
    %c0_52 = arith.constant 0 : index
    %58 = tpu.strided_load %arg26[%c1_51, %c0_52] {strides = array<i32: 2, 1>} : memref<3x64xf32, #tpu.memory_space<vmem>>, vector<1x64xf32>
    %c2_53 = arith.constant 2 : index
    %c0_54 = arith.constant 0 : index
    %59 = tpu.strided_load %arg26[%c2_53, %c0_54] {strides = array<i32: 2, 1>} : memref<3x64xf32, #tpu.memory_space<vmem>>, vector<1x64xf32>
    %60 = tpu.concatenate %57, %58, %59 in 1 : vector<1x64xf32>, vector<1x64xf32>, vector<1x64xf32> -> vector<1x192xf32>
    %c0_55 = arith.constant 0 : index
    %c0_56 = arith.constant 0 : index
    %61 = vector.load %arg8[%c0_55, %c0_56] : memref<192x128xf32, #tpu.memory_space<vmem>>, vector<192x128xf32>
    %cst_57 = arith.constant dense<0.000000e+00> : vector<1x128xf32>
    %62 = tpu.matmul %60, %61, %cst_57 {dimension_numbers = #tpu.dot_dimension_numbers<[1], [0], [0], [1], [0, 0, 1, 1], [], []>} : vector<1x192xf32>, vector<192x128xf32>, vector<1x128xf32> -> vector<1x128xf32>
    %c0_58 = arith.constant 0 : index
    %c0_59 = arith.constant 0 : index
    %63 = vector.load %arg9[%c0_58, %c0_59] : memref<1x128xf32, #tpu.memory_space<vmem>>, vector<1x128xf32>
    %64 = arith.addf %62, %63 : vector<1x128xf32>
    %cst_60 = arith.constant 0.000000e+00 : f32
    %65 = vector.broadcast %cst_60 : f32 to vector<1x128xf32>
    %66 = arith.maximumf %64, %65 : vector<1x128xf32>
    %c0_61 = arith.constant 0 : index
    %c0_62 = arith.constant 0 : index
    %67 = vector.load %arg27[%c0_61, %c0_62] : memref<2x128xf32, #tpu.memory_space<vmem>>, vector<1x128xf32>
    tpu.vector_store %arg27[%c0_61, %c0_62], %66 {strides = array<i32>} : memref<2x128xf32, #tpu.memory_space<vmem>>, vector<1x128xf32>,
    %cst_63 = arith.constant 0.000000e+00 : f32
    %68 = vector.broadcast %cst_63 : f32 to vector<1x128xf32>
    %c1_64 = arith.constant 1 : index
    %c0_65 = arith.constant 0 : index
    %69 = vector.load %arg27[%c1_64, %c0_65] : memref<2x128xf32, #tpu.memory_space<vmem>>, vector<1x128xf32>
    tpu.vector_store %arg27[%c1_64, %c0_65], %68 {strides = array<i32>} : memref<2x128xf32, #tpu.memory_space<vmem>>, vector<1x128xf32>,
    %c0_66 = arith.constant 0 : index
    %c0_67 = arith.constant 0 : index
    %70 = vector.load %arg27[%c0_66, %c0_67] : memref<2x128xf32, #tpu.memory_space<vmem>>, vector<1x128xf32>
    %c1_68 = arith.constant 1 : index
    %c0_69 = arith.constant 0 : index
    %71 = vector.load %arg27[%c1_68, %c0_69] : memref<2x128xf32, #tpu.memory_space<vmem>>, vector<1x128xf32>
    %c0_70 = arith.constant 0 : index
    %c0_71 = arith.constant 0 : index
    %72 = vector.load %arg10[%c0_70, %c0_71] : memref<128x128xf32, #tpu.memory_space<vmem>>, vector<128x128xf32>
    %cst_72 = arith.constant dense<0.000000e+00> : vector<1x128xf32>
    %73 = tpu.matmul %70, %72, %cst_72 {dimension_numbers = #tpu.dot_dimension_numbers<[1], [0], [0], [1], [0, 0, 1, 1], [], []>} : vector<1x128xf32>, vector<128x128xf32>, vector<1x128xf32> -> vector<1x128xf32>
    %c0_73 = arith.constant 0 : index
    %c0_74 = arith.constant 0 : index
    %74 = vector.load %arg12[%c0_73, %c0_74] : memref<1x128xf32, #tpu.memory_space<vmem>>, vector<1x128xf32>
    %75 = arith.addf %73, %74 : vector<1x128xf32>
    %76 = tpu.concatenate %70, %71 in 1 : vector<1x128xf32>, vector<1x128xf32> -> vector<1x256xf32>
    %c0_75 = arith.constant 0 : index
    %c0_76 = arith.constant 0 : index
    %77 = vector.load %arg11[%c0_75, %c0_76] : memref<256x128xf32, #tpu.memory_space<vmem>>, vector<256x128xf32>
    %cst_77 = arith.constant dense<0.000000e+00> : vector<1x128xf32>
    %78 = tpu.matmul %76, %77, %cst_77 {dimension_numbers = #tpu.dot_dimension_numbers<[1], [0], [0], [1], [0, 0, 1, 1], [], []>} : vector<1x256xf32>, vector<256x128xf32>, vector<1x128xf32> -> vector<1x128xf32>
    %c0_78 = arith.constant 0 : index
    %c0_79 = arith.constant 0 : index
    %79 = vector.load %arg12[%c0_78, %c0_79] : memref<1x128xf32, #tpu.memory_space<vmem>>, vector<1x128xf32>
    %80 = arith.addf %78, %79 : vector<1x128xf32>
    %cst_80 = arith.constant 0.000000e+00 : f32
    %81 = vector.broadcast %cst_80 : f32 to vector<1x128xf32>
    %82 = arith.maximumf %75, %81 : vector<1x128xf32>
    %cst_81 = arith.constant 0.000000e+00 : f32
    %83 = vector.broadcast %cst_81 : f32 to vector<1x128xf32>
    %84 = arith.maximumf %80, %83 : vector<1x128xf32>
    %c0_82 = arith.constant 0 : index
    %c0_83 = arith.constant 0 : index
    %85 = tpu.strided_load %arg28[%c0_82, %c0_83] {strides = array<i32: 2, 1>} : memref<3x128xf32, #tpu.memory_space<vmem>>, vector<1x128xf32>
    tpu.strided_store %arg28[%c0_82, %c0_83], %82 {strides = array<i32: 2, 1>} : memref<3x128xf32, #tpu.memory_space<vmem>>, vector<1x128xf32>
    %c1_84 = arith.constant 1 : index
    %c0_85 = arith.constant 0 : index
    %86 = tpu.strided_load %arg28[%c1_84, %c0_85] {strides = array<i32: 2, 1>} : memref<3x128xf32, #tpu.memory_space<vmem>>, vector<1x128xf32>
    tpu.strided_store %arg28[%c1_84, %c0_85], %84 {strides = array<i32: 2, 1>} : memref<3x128xf32, #tpu.memory_space<vmem>>, vector<1x128xf32>
    %cst_86 = arith.constant 0.000000e+00 : f32
    %87 = vector.broadcast %cst_86 : f32 to vector<1x128xf32>
    %c2_87 = arith.constant 2 : index
    %c0_88 = arith.constant 0 : index
    %88 = vector.load %arg28[%c2_87, %c0_88] : memref<3x128xf32, #tpu.memory_space<vmem>>, vector<1x128xf32>
    tpu.vector_store %arg28[%c2_87, %c0_88], %87 {strides = array<i32>} : memref<3x128xf32, #tpu.memory_space<vmem>>, vector<1x128xf32>,
    %c0_89 = arith.constant 0 : index
    %c0_90 = arith.constant 0 : index
    %89 = vector.load %arg28[%c0_89, %c0_90] : memref<3x128xf32, #tpu.memory_space<vmem>>, vector<2x128xf32>
    %c1_91 = arith.constant 1 : index
    %c0_92 = arith.constant 0 : index
    %90 = vector.load %arg28[%c1_91, %c0_92] : memref<3x128xf32, #tpu.memory_space<vmem>>, vector<2x128xf32>
    %c0_93 = arith.constant 0 : index
    %c0_94 = arith.constant 0 : index
    %91 = vector.load %arg13[%c0_93, %c0_94] : memref<128x64xf32, #tpu.memory_space<vmem>>, vector<128x64xf32>
    %cst_95 = arith.constant dense<0.000000e+00> : vector<2x64xf32>
    %92 = tpu.matmul %89, %91, %cst_95 {dimension_numbers = #tpu.dot_dimension_numbers<[1], [0], [0], [1], [0, 0, 1, 1], [], []>} : vector<2x128xf32>, vector<128x64xf32>, vector<2x64xf32> -> vector<2x64xf32>
    %c0_96 = arith.constant 0 : index
    %c0_97 = arith.constant 0 : index
    %93 = vector.load %arg15[%c0_96, %c0_97] : memref<1x64xf32, #tpu.memory_space<vmem>>, vector<1x64xf32>
    %94 = vector.broadcast %93 : vector<1x64xf32> to vector<2x64xf32>
    %95 = arith.addf %92, %94 : vector<2x64xf32>
    %96 = tpu.concatenate %89, %90 in 1 : vector<2x128xf32>, vector<2x128xf32> -> vector<2x256xf32>
    %c0_98 = arith.constant 0 : index
    %c0_99 = arith.constant 0 : index
    %97 = vector.load %arg14[%c0_98, %c0_99] : memref<256x64xf32, #tpu.memory_space<vmem>>, vector<256x64xf32>
    %cst_100 = arith.constant dense<0.000000e+00> : vector<2x64xf32>
    %98 = tpu.matmul %96, %97, %cst_100 {dimension_numbers = #tpu.dot_dimension_numbers<[1], [0], [0], [1], [0, 0, 1, 1], [], []>} : vector<2x256xf32>, vector<256x64xf32>, vector<2x64xf32> -> vector<2x64xf32>
    %c0_101 = arith.constant 0 : index
    %c0_102 = arith.constant 0 : index
    %99 = vector.load %arg15[%c0_101, %c0_102] : memref<1x64xf32, #tpu.memory_space<vmem>>, vector<1x64xf32>
    %100 = vector.broadcast %99 : vector<1x64xf32> to vector<2x64xf32>
    %101 = arith.addf %98, %100 : vector<2x64xf32>
    %cst_103 = arith.constant 0.000000e+00 : f32
    %102 = vector.broadcast %cst_103 : f32 to vector<2x64xf32>
    %103 = arith.maximumf %95, %102 : vector<2x64xf32>
    %cst_104 = arith.constant 0.000000e+00 : f32
    %104 = vector.broadcast %cst_104 : f32 to vector<2x64xf32>
    %105 = arith.maximumf %101, %104 : vector<2x64xf32>
    %c0_105 = arith.constant 0 : index
    %c0_106 = arith.constant 0 : index
    %106 = tpu.strided_load %arg29[%c0_105, %c0_106] {strides = array<i32: 2, 1>} : memref<5x64xf32, #tpu.memory_space<vmem>>, vector<2x64xf32>
    tpu.strided_store %arg29[%c0_105, %c0_106], %103 {strides = array<i32: 2, 1>} : memref<5x64xf32, #tpu.memory_space<vmem>>, vector<2x64xf32>
    %c1_107 = arith.constant 1 : index
    %c0_108 = arith.constant 0 : index
    %107 = tpu.strided_load %arg29[%c1_107, %c0_108] {strides = array<i32: 2, 1>} : memref<5x64xf32, #tpu.memory_space<vmem>>, vector<2x64xf32>
    tpu.strided_store %arg29[%c1_107, %c0_108], %105 {strides = array<i32: 2, 1>} : memref<5x64xf32, #tpu.memory_space<vmem>>, vector<2x64xf32>
    %cst_109 = arith.constant 0.000000e+00 : f32
    %108 = vector.broadcast %cst_109 : f32 to vector<1x64xf32>
    %c4 = arith.constant 4 : index
    %c0_110 = arith.constant 0 : index
    %109 = vector.load %arg29[%c4, %c0_110] : memref<5x64xf32, #tpu.memory_space<vmem>>, vector<1x64xf32>
    tpu.vector_store %arg29[%c4, %c0_110], %108 {strides = array<i32>} : memref<5x64xf32, #tpu.memory_space<vmem>>, vector<1x64xf32>,
    %c0_111 = arith.constant 0 : index
    %c0_112 = arith.constant 0 : index
    %110 = vector.load %arg29[%c0_111, %c0_112] : memref<5x64xf32, #tpu.memory_space<vmem>>, vector<4x64xf32>
    %c1_113 = arith.constant 1 : index
    %c0_114 = arith.constant 0 : index
    %111 = vector.load %arg29[%c1_113, %c0_114] : memref<5x64xf32, #tpu.memory_space<vmem>>, vector<4x64xf32>
    %c0_115 = arith.constant 0 : index
    %c0_116 = arith.constant 0 : index
    %112 = vector.load %arg16[%c0_115, %c0_116] : memref<64x32xf32, #tpu.memory_space<vmem>>, vector<64x32xf32>
    %cst_117 = arith.constant dense<0.000000e+00> : vector<4x32xf32>
    %113 = tpu.matmul %110, %112, %cst_117 {dimension_numbers = #tpu.dot_dimension_numbers<[1], [0], [0], [1], [0, 0, 1, 1], [], []>} : vector<4x64xf32>, vector<64x32xf32>, vector<4x32xf32> -> vector<4x32xf32>
    %c0_118 = arith.constant 0 : index
    %c0_119 = arith.constant 0 : index
    %114 = vector.load %arg18[%c0_118, %c0_119] : memref<1x32xf32, #tpu.memory_space<vmem>>, vector<1x32xf32>
    %115 = vector.broadcast %114 : vector<1x32xf32> to vector<4x32xf32>
    %116 = arith.addf %113, %115 : vector<4x32xf32>
    %117 = tpu.concatenate %110, %111 in 1 : vector<4x64xf32>, vector<4x64xf32> -> vector<4x128xf32>
    %c0_120 = arith.constant 0 : index
    %c0_121 = arith.constant 0 : index
    %118 = vector.load %arg17[%c0_120, %c0_121] : memref<128x32xf32, #tpu.memory_space<vmem>>, vector<128x32xf32>
    %cst_122 = arith.constant dense<0.000000e+00> : vector<4x32xf32>
    %119 = tpu.matmul %117, %118, %cst_122 {dimension_numbers = #tpu.dot_dimension_numbers<[1], [0], [0], [1], [0, 0, 1, 1], [], []>} : vector<4x128xf32>, vector<128x32xf32>, vector<4x32xf32> -> vector<4x32xf32>
    %c0_123 = arith.constant 0 : index
    %c0_124 = arith.constant 0 : index
    %120 = vector.load %arg18[%c0_123, %c0_124] : memref<1x32xf32, #tpu.memory_space<vmem>>, vector<1x32xf32>
    %121 = vector.broadcast %120 : vector<1x32xf32> to vector<4x32xf32>
    %122 = arith.addf %119, %121 : vector<4x32xf32>
    %cst_125 = arith.constant 0.000000e+00 : f32
    %123 = vector.broadcast %cst_125 : f32 to vector<4x32xf32>
    %124 = arith.maximumf %116, %123 : vector<4x32xf32>
    %cst_126 = arith.constant 0.000000e+00 : f32
    %125 = vector.broadcast %cst_126 : f32 to vector<4x32xf32>
    %126 = arith.maximumf %122, %125 : vector<4x32xf32>
    %c0_127 = arith.constant 0 : index
    %c0_128 = arith.constant 0 : index
    %127 = tpu.strided_load %arg30[%c0_127, %c0_128] {strides = array<i32: 2, 1>} : memref<9x32xf32, #tpu.memory_space<vmem>>, vector<4x32xf32>
    tpu.strided_store %arg30[%c0_127, %c0_128], %124 {strides = array<i32: 2, 1>} : memref<9x32xf32, #tpu.memory_space<vmem>>, vector<4x32xf32>
    %c1_129 = arith.constant 1 : index
    %c0_130 = arith.constant 0 : index
    %128 = tpu.strided_load %arg30[%c1_129, %c0_130] {strides = array<i32: 2, 1>} : memref<9x32xf32, #tpu.memory_space<vmem>>, vector<4x32xf32>
    tpu.strided_store %arg30[%c1_129, %c0_130], %126 {strides = array<i32: 2, 1>} : memref<9x32xf32, #tpu.memory_space<vmem>>, vector<4x32xf32>
    %cst_131 = arith.constant 0.000000e+00 : f32
    %129 = vector.broadcast %cst_131 : f32 to vector<1x32xf32>
    %c8 = arith.constant 8 : index
    %c0_132 = arith.constant 0 : index
    %130 = vector.load %arg30[%c8, %c0_132] : memref<9x32xf32, #tpu.memory_space<vmem>>, vector<1x32xf32>
    tpu.vector_store %arg30[%c8, %c0_132], %129 {strides = array<i32>} : memref<9x32xf32, #tpu.memory_space<vmem>>, vector<1x32xf32>,
    %c0_133 = arith.constant 0 : index
    %c0_134 = arith.constant 0 : index
    %131 = vector.load %arg30[%c0_133, %c0_134] : memref<9x32xf32, #tpu.memory_space<vmem>>, vector<8x32xf32>
    %c1_135 = arith.constant 1 : index
    %c0_136 = arith.constant 0 : index
    %132 = vector.load %arg30[%c1_135, %c0_136] : memref<9x32xf32, #tpu.memory_space<vmem>>, vector<8x32xf32>
    %c0_137 = arith.constant 0 : index
    %c0_138 = arith.constant 0 : index
    %133 = vector.load %arg19[%c0_137, %c0_138] : memref<32x2xf32, #tpu.memory_space<vmem>>, vector<32x2xf32>
    %cst_139 = arith.constant dense<0.000000e+00> : vector<8x2xf32>
    %134 = tpu.matmul %131, %133, %cst_139 {dimension_numbers = #tpu.dot_dimension_numbers<[1], [0], [0], [1], [0, 0, 1, 1], [], []>} : vector<8x32xf32>, vector<32x2xf32>, vector<8x2xf32> -> vector<8x2xf32>
    %c0_140 = arith.constant 0 : index
    %c0_141 = arith.constant 0 : index
    %135 = vector.load %arg21[%c0_140, %c0_141] : memref<1x2xf32, #tpu.memory_space<vmem>>, vector<1x2xf32>
    %136 = vector.broadcast %135 : vector<1x2xf32> to vector<8x2xf32>
    %137 = arith.addf %134, %136 : vector<8x2xf32>
    %138 = tpu.concatenate %131, %132 in 1 : vector<8x32xf32>, vector<8x32xf32> -> vector<8x64xf32>
    %c0_142 = arith.constant 0 : index
    %c0_143 = arith.constant 0 : index
    %139 = vector.load %arg20[%c0_142, %c0_143] : memref<64x2xf32, #tpu.memory_space<vmem>>, vector<64x2xf32>
    %cst_144 = arith.constant dense<0.000000e+00> : vector<8x2xf32>
    %140 = tpu.matmul %138, %139, %cst_144 {dimension_numbers = #tpu.dot_dimension_numbers<[1], [0], [0], [1], [0, 0, 1, 1], [], []>} : vector<8x64xf32>, vector<64x2xf32>, vector<8x2xf32> -> vector<8x2xf32>
    %c0_145 = arith.constant 0 : index
    %c0_146 = arith.constant 0 : index
    %141 = vector.load %arg21[%c0_145, %c0_146] : memref<1x2xf32, #tpu.memory_space<vmem>>, vector<1x2xf32>
    %142 = vector.broadcast %141 : vector<1x2xf32> to vector<8x2xf32>
    %143 = arith.addf %140, %142 : vector<8x2xf32>
    %cst_147 = arith.constant 0.000000e+00 : f32
    %144 = vector.broadcast %cst_147 : f32 to vector<8x2xf32>
    %145 = arith.subf %144, %137 : vector<8x2xf32>
    %146 = math.exp %145 : vector<8x2xf32>
    %cst_148 = arith.constant 1.000000e+00 : f32
    %147 = vector.broadcast %cst_148 : f32 to vector<8x2xf32>
    %148 = arith.addf %147, %146 : vector<8x2xf32>
    %149 = tpu.reciprocal %148 {approx = true} : vector<8x2xf32> -> vector<8x2xf32>
    %cst_149 = arith.constant 0.000000e+00 : f32
    %150 = vector.broadcast %cst_149 : f32 to vector<8x2xf32>
    %151 = arith.subf %150, %143 : vector<8x2xf32>
    %152 = math.exp %151 : vector<8x2xf32>
    %cst_150 = arith.constant 1.000000e+00 : f32
    %153 = vector.broadcast %cst_150 : f32 to vector<8x2xf32>
    %154 = arith.addf %153, %152 : vector<8x2xf32>
    %155 = tpu.reciprocal %154 {approx = true} : vector<8x2xf32> -> vector<8x2xf32>
    %156 = tpu.transpose %149, [1, 0] : vector<8x2xf32> -> vector<2x8xf32>
    %c0_151 = arith.constant 0 : index
    %c0_152 = arith.constant 0 : index
    %c0_153 = arith.constant 0 : index
    %157 = vector.load %arg22[%c0_151, %c0_152, %c0_153] : memref<1x2x8xf32, #tpu.memory_space<vmem>>, vector<1x2x8xf32>
    %158 = vector.shape_cast %157 : vector<1x2x8xf32> to vector<2x8xf32>
    %159 = vector.shape_cast %156 : vector<2x8xf32> to vector<1x2x8xf32>
    tpu.vector_store %arg22[%c0_151, %c0_152, %c0_153], %159 {strides = array<i32>} : memref<1x2x8xf32, #tpu.memory_space<vmem>>, vector<1x2x8xf32>,
    %160 = tpu.transpose %155, [1, 0] : vector<8x2xf32> -> vector<2x8xf32>
    %c0_154 = arith.constant 0 : index
    %c0_155 = arith.constant 0 : index
    %c0_156 = arith.constant 0 : index
    %161 = vector.load %arg23[%c0_154, %c0_155, %c0_156] : memref<1x2x8xf32, #tpu.memory_space<vmem>>, vector<1x2x8xf32>
    %162 = vector.shape_cast %161 : vector<1x2x8xf32> to vector<2x8xf32>
    %163 = vector.shape_cast %160 : vector<2x8xf32> to vector<1x2x8xf32>
    tpu.vector_store %arg23[%c0_154, %c0_155, %c0_156], %163 {strides = array<i32>} : memref<1x2x8xf32, #tpu.memory_space<vmem>>, vector<1x2x8xf32>,
    return
  }
  func.func @transform_0(%arg0: i32) -> (i32, i32, i32) {
    %c0_i32 = arith.constant 0 : i32
    %c0_i32_0 = arith.constant 0 : i32
    %c0_i32_1 = arith.constant 0 : i32
    return %arg0, %c0_i32, %c0_i32_0 : i32, i32, i32
  }
  func.func @transform_1(%arg0: i32) -> (i32, i32) {
    %c0_i32 = arith.constant 0 : i32
    %c0_i32_0 = arith.constant 0 : i32
    %c0_i32_1 = arith.constant 0 : i32
    return %c0_i32, %c0_i32_0 : i32, i32
  }
  func.func @transform_2(%arg0: i32) -> (i32, i32) {
    %c0_i32 = arith.constant 0 : i32
    %c0_i32_0 = arith.constant 0 : i32
    %c0_i32_1 = arith.constant 0 : i32
    return %c0_i32, %c0_i32_0 : i32, i32
  }
  func.func @transform_3(%arg0: i32) -> (i32, i32) {
    %c0_i32 = arith.constant 0 : i32
    %c0_i32_0 = arith.constant 0 : i32
    %c0_i32_1 = arith.constant 0 : i32
    return %c0_i32, %c0_i32_0 : i32, i32
  }
  func.func @transform_4(%arg0: i32) -> (i32, i32) {
    %c0_i32 = arith.constant 0 : i32
    %c0_i32_0 = arith.constant 0 : i32
    %c0_i32_1 = arith.constant 0 : i32
    return %c0_i32, %c0_i32_0 : i32, i32
  }
  func.func @transform_5(%arg0: i32) -> (i32, i32) {
    %c0_i32 = arith.constant 0 : i32
    %c0_i32_0 = arith.constant 0 : i32
    %c0_i32_1 = arith.constant 0 : i32
    return %c0_i32, %c0_i32_0 : i32, i32
  }
  func.func @transform_6(%arg0: i32) -> (i32, i32) {
    %c0_i32 = arith.constant 0 : i32
    %c0_i32_0 = arith.constant 0 : i32
    %c0_i32_1 = arith.constant 0 : i32
    return %c0_i32, %c0_i32_0 : i32, i32
  }
  func.func @transform_7(%arg0: i32) -> (i32, i32) {
    %c0_i32 = arith.constant 0 : i32
    %c0_i32_0 = arith.constant 0 : i32
    %c0_i32_1 = arith.constant 0 : i32
    return %c0_i32, %c0_i32_0 : i32, i32
  }
  func.func @transform_8(%arg0: i32) -> (i32, i32) {
    %c0_i32 = arith.constant 0 : i32
    %c0_i32_0 = arith.constant 0 : i32
    %c0_i32_1 = arith.constant 0 : i32
    return %c0_i32, %c0_i32_0 : i32, i32
  }
  func.func @transform_9(%arg0: i32) -> (i32, i32) {
    %c0_i32 = arith.constant 0 : i32
    %c0_i32_0 = arith.constant 0 : i32
    %c0_i32_1 = arith.constant 0 : i32
    return %c0_i32, %c0_i32_0 : i32, i32
  }
  func.func @transform_10(%arg0: i32) -> (i32, i32) {
    %c0_i32 = arith.constant 0 : i32
    %c0_i32_0 = arith.constant 0 : i32
    %c0_i32_1 = arith.constant 0 : i32
    return %c0_i32, %c0_i32_0 : i32, i32
  }
  func.func @transform_11(%arg0: i32) -> (i32, i32) {
    %c0_i32 = arith.constant 0 : i32
    %c0_i32_0 = arith.constant 0 : i32
    %c0_i32_1 = arith.constant 0 : i32
    return %c0_i32, %c0_i32_0 : i32, i32
  }
  func.func @transform_12(%arg0: i32) -> (i32, i32) {
    %c0_i32 = arith.constant 0 : i32
    %c0_i32_0 = arith.constant 0 : i32
    %c0_i32_1 = arith.constant 0 : i32
    return %c0_i32, %c0_i32_0 : i32, i32
  }
  func.func @transform_13(%arg0: i32) -> (i32, i32) {
    %c0_i32 = arith.constant 0 : i32
    %c0_i32_0 = arith.constant 0 : i32
    %c0_i32_1 = arith.constant 0 : i32
    return %c0_i32, %c0_i32_0 : i32, i32
  }
  func.func @transform_14(%arg0: i32) -> (i32, i32) {
    %c0_i32 = arith.constant 0 : i32
    %c0_i32_0 = arith.constant 0 : i32
    %c0_i32_1 = arith.constant 0 : i32
    return %c0_i32, %c0_i32_0 : i32, i32
  }
  func.func @transform_15(%arg0: i32) -> (i32, i32) {
    %c0_i32 = arith.constant 0 : i32
    %c0_i32_0 = arith.constant 0 : i32
    %c0_i32_1 = arith.constant 0 : i32
    return %c0_i32, %c0_i32_0 : i32, i32
  }
  func.func @transform_16(%arg0: i32) -> (i32, i32) {
    %c0_i32 = arith.constant 0 : i32
    %c0_i32_0 = arith.constant 0 : i32
    %c0_i32_1 = arith.constant 0 : i32
    return %c0_i32, %c0_i32_0 : i32, i32
  }
  func.func @transform_17(%arg0: i32) -> (i32, i32) {
    %c0_i32 = arith.constant 0 : i32
    %c0_i32_0 = arith.constant 0 : i32
    %c0_i32_1 = arith.constant 0 : i32
    return %c0_i32, %c0_i32_0 : i32, i32
  }
  func.func @transform_18(%arg0: i32) -> (i32, i32) {
    %c0_i32 = arith.constant 0 : i32
    %c0_i32_0 = arith.constant 0 : i32
    %c0_i32_1 = arith.constant 0 : i32
    return %c0_i32, %c0_i32_0 : i32, i32
  }
  func.func @transform_19(%arg0: i32) -> (i32, i32) {
    %c0_i32 = arith.constant 0 : i32
    %c0_i32_0 = arith.constant 0 : i32
    %c0_i32_1 = arith.constant 0 : i32
    return %c0_i32, %c0_i32_0 : i32, i32
  }
  func.func @transform_20(%arg0: i32) -> (i32, i32) {
    %c0_i32 = arith.constant 0 : i32
    %c0_i32_0 = arith.constant 0 : i32
    %c0_i32_1 = arith.constant 0 : i32
    return %c0_i32, %c0_i32_0 : i32, i32
  }
  func.func @transform_21(%arg0: i32) -> (i32, i32, i32) {
    %c0_i32 = arith.constant 0 : i32
    %c0_i32_0 = arith.constant 0 : i32
    %c0_i32_1 = arith.constant 0 : i32
    return %arg0, %c0_i32, %c0_i32_0 : i32, i32, i32
  }
  func.func @transform_22(%arg0: i32) -> (i32, i32, i32) {
    %c0_i32 = arith.constant 0 : i32
    %c0_i32_0 = arith.constant 0 : i32
    %c0_i32_1 = arith.constant 0 : i32
    return %arg0, %c0_i32, %c0_i32_0 : i32, i32, i32
  }
}

</mosaic_0001>

<bundles_post_ra>
// kernel: conv1ddenoise_forward.1
= control target key start
LH: loop header
LB: loop body
LE: loop exit
PB: predicated region body
PF: predicated region fallthrough
CT: control target
= control target key end

     0   :  { %s2254_s0 = inlined_call_operand.vmem [shape: f32[2,17,1], index: 0, kind: input, shape index: {}]   ;;  %s2255_s1 = inlined_call_operand.vmem [shape: f32[3,16], index: 1, kind: input, shape index: {}]   ;;  %s2256_s2 = inlined_call_operand.vmem [shape: f32[1,16], index: 2, kind: input, shape index: {}]   ;;  %s2257_s3 = inlined_call_operand.vmem [shape: f32[48,32], index: 3, kind: input, shape index: {}]   ;;  %s2258_s4 = inlined_call_operand.vmem [shape: f32[1,32], index: 4, kind: input, shape index: {}]   ;;  %s2259_s5 = inlined_call_operand.vmem [shape: f32[96,64], index: 5, kind: input, shape index: {}]   ;;  %s2260_s6 = inlined_call_operand.vmem [shape: f32[1,64], index: 6, kind: input, shape index: {}]   ;;  %s2261_s7 = inlined_call_operand.vmem [shape: f32[192,128], index: 7, kind: input, shape index: {}]   ;;  %s2262_s8 = inlined_call_operand.vmem [shape: f32[1,128], index: 8, kind: input, shape index: {}]   ;;  %s2263_s9 = inlined_call_operand.vmem [shape: f32[128,128], index: 9, kind: input, shape index: {}]   ;;  %s2264_s10 = inlined_call_operand.vmem [shape: f32[256,128], index: 10, kind: input, shape index: {}]   ;;  %s2265_s11 = inlined_call_operand.vmem [shape: f32[1,128], index: 11, kind: input, shape index: {}]   ;;  %s2266_s12 = inlined_call_operand.vmem [shape: f32[128,64], index: 12, kind: input, shape index: {}]   ;;  %s2267_s13 = inlined_call_operand.vmem [shape: f32[256,64], index: 13, kind: input, shape index: {}]   ;;  %s2268_s14 = inlined_call_operand.vmem [shape: f32[1,64], index: 14, kind: input, shape index: {}]   ;;  %s2269_s15 = inlined_call_operand.vmem [shape: f32[64,32], index: 15, kind: input, shape index: {}]   ;;  %s2270_s16 = inlined_call_operand.vmem [shape: f32[128,32], index: 16, kind: input, shape index: {}]   ;;  %s2271_s17 = inlined_call_operand.vmem [shape: f32[1,32], index: 17, kind: input, shape index: {}]   ;;  %s2272_s18 = inlined_call_operand.vmem [shape: f32[32,2], index: 18, kind: input, shape index: {}]   ;;  %s2273_s19 = inlined_call_operand.vmem [shape: f32[64,2], index: 19, kind: input, shape index: {}]   ;;  %s2274_s20 = inlined_call_operand.vmem [shape: f32[1,2], index: 20, kind: input, shape index: {}]   ;;  %s2275_s21 = inlined_call_operand.vmem [shape: f32[2,2,8], index: 21, kind: output, shape index: {0}]   ;;  %s2276_s22 = inlined_call_operand.vmem [shape: f32[2,2,8], index: 22, kind: output, shape index: {1}]  }
   0x1   :  { %2282 = sst [smem:[#allocation9_spill]] %s2254_s0 }
   0x2   :  { %2283 = sst [smem:[#allocation10_spill]] %s2255_s1 }
   0x3   :  { %2284 = sst [smem:[#allocation11_spill]] %s2256_s2 }
   0x4   :  { %2285 = sst [smem:[#allocation12_spill]] %s2257_s3  ;;  %s1656_s3 = smov 0  }
   0x5   :  { %2286 = sst [smem:[#allocation13_spill]] %s2258_s4 }
   0x6   :  { %2287 = sst [smem:[#allocation14_spill]] %s2259_s5 }
   0x7   :  { %2288 = sst [smem:[#allocation15_spill]] %s2260_s6 }
   0x8 LB: > { %s1480_s28 = sadd.s32 4294967295, %s1534_s3   ;;  %p1484_p0 = scmp.ge.s32.totalorder %s1534_s3, 1  ;;  %s1534_s3 = sphi %s1656_s3, %s33_s3  }
   0x9   : > { %p615_p1 = scmp.lt.s32.totalorder %s1534_s3, 3 }
   0xb   : > { %p616_p2 = pnand %p1484_p0, %p615_p1 }
   0xc   : > { %p680_p3 = scmp.lt.s32.totalorder (!%p616_p2), %s1480_s28, 1  ;;  %s2289_s0 = sld [smem:[#allocation9_spill]] (!%p616_p2) }
   0xd   : > { %619 = sbr.rel (%p616_p2) target bundleno = 1881 (0x759), region = 104  ;;  %s2290_s24 = sld [smem:[#allocation10_spill]] (!%p616_p2) }
   0xe   : > { %s2291_s26 = sld [smem:[#allocation11_spill]] (!%p616_p2)  ;;  %s2279_s2 = smov (!%p616_p2), 32  }
   0xf   : > { %s1539_s27 = smov (!%p616_p2), 16   ;;  %s2292_s4 = sld [smem:[#allocation12_spill]] (!%p616_p2) }
  0x10   : > { %s2280_s1 = smov (!%p616_p2), 64   ;;  %s2294_s6 = sld [smem:[#allocation14_spill]] (!%p616_p2) }
  0x11   : > { %s2295_s5 = sld [smem:[#allocation15_spill]] (!%p616_p2) }
  0x12   : > { %v1536_v0 = vmov 0   ;;  %s2299_s28 = smov (!%p680_p3, %s1480_s28), 1  ;;  %vm728_vm0 = vcmask 122880   ;;  %v1537_v4 = vmov 0.0   ;;  %vm730_vm1 = vcmask 130048   ;;  %v881_v51 = vld [vmem:[%s2261_s7 + $0xb8] sm:$0xff] }
  0x13   : > { %1512 = vset.pattern.permute.xlu0 %v1536_v0  ;;  %1513 = vset.pattern.permute.xlu1 %v1536_v0  ;;  %s1498_s29 = smul.u32 24, %s2299_s28  ;;  %729 = vst.msk [vmem:[#allocation2] sm:$0x1] %vm728_vm0, %v1537_v4  ;;  %v698_v6 = vld [vmem:[%s2290_s24] sm:$0x7]  ;;  %vm746_vm2 = vcmask 261120  }
  0x14   : > { %928 = vst [vmem:[#allocation5 + $0x1] sm:$0x1] %v1537_v4  ;;  %v704_v7 = vperm.slane %v698_v6, 0  ;;  %v711_v8 = vperm.slane %v698_v6, 1  ;;  %v719_v9 = vperm.slane %v698_v6, 2  ;;  %vm758_vm3 = vcmask 392192   ;;  %914 = vmatpush.msra.mxu3 %v881_v51 }
  0x15   : > { %s684_s23 = scalar_lea.vmem %s2289_s0, %s1498_s29  ;;  %1045 = vst [vmem:[#allocation6 + $0x2] sm:$0x1] %v1537_v4  ;;  %v1514_v16 = vld [vmem:[%s2291_s26] ss:$0 sm:$0xff]  ;;  %v753_v22 = vld [vmem:[%s2292_s4 + $0x28] sm:$0xff]  ;;  %v751_v24 = vld [vmem:[%s2292_s4 + $0x18] sm:$0xff] }
  0x16   : > { %v693_v1 = vld [vmem:[%s684_s23] ss:$2 sm:$0xff]  ;;  %v1488_v3 = vld [vmem:[%s684_s23 + $0x1] ss:$2 sm:$0xff]  ;;  %772 = vmatpush.msra.mxu0 %v753_v22  ;;  %v750_v25 = vld [vmem:[%s2292_s4 + $0x10] sm:$0xff]  ;;  %vm783_vm4 = vcmask 253952  }
  0x17   : > { %v1489_v2 = vld [vmem:[%s684_s23 + $0x2] ss:$2 sm:$0xff]  ;;  %701 = vperm.xlu0 %1512, %v693_v1   ;;  %784 = vst.msk [vmem:[#allocation3] sm:$0x1] %vm783_vm4, %v1537_v4  ;;  %s2293_s23 = sld [smem:[#allocation13_spill]]  ;;  %vm785_vm5 = vcmask 257024  }
  0x18   : > { %716 = vperm.xlu1 %1513, %v1489_v2   ;;  %v752_v23 = vld [vmem:[%s2292_s4 + $0x20] sm:$0xff]  ;;  %v749_v26 = vld [vmem:[%s2292_s4 + $0x8] sm:$0xff]  ;;  %1249 = vst.msk [vmem:[#allocation8 + $0x8] sm:$0x1] %vm783_vm4, %v1537_v4  ;;  %v814_v39 = vld [vmem:[%s2294_s6 + $0x58] sm:$0xff]  ;;  %vm801_vm6 = vcmask 523264  }
  0x19   : > { %773 = vmatpush.msra.mxu0 %v752_v23  ;;  %v748_v27 = vld [vmem:[%s2292_s4] sm:$0xff]  ;;  %v813_v40 = vld [vmem:[%s2294_s6 + $0x50] sm:$0xff]  ;;  %827 = vmatpush.msra.mxu1 %v814_v39  ;;  %v812_v41 = vld [vmem:[%s2294_s6 + $0x48] sm:$0xff]  ;;  %vm819_vm7 = vcmask 785408   ;;  %vm846_vm8 = vcmask 517120   ;;  %s2296_s24 = smov 64  }
  0x1a   : > { %v811_v42 = vld [vmem:[%s2294_s6 + $0x40] sm:$0xff]  ;;  %v810_v43 = vld [vmem:[%s2294_s6 + $0x38] sm:$0xff]  ;;  %v809_v44 = vld [vmem:[%s2294_s6 + $0x30] sm:$0xff]  ;;  %vm844_vm9 = vcmask 516096   ;;  %s1486_s30 = sshll.u32 %s2299_s28, 1  ;;  %vm1361_vm10 = vcmask 58368  }
  0x1b   : > { %774 = vmatpush.msra.mxu0 %v751_v24  ;;  %828 = vmatpush.msra.mxu1 %v813_v40  ;;  %v808_v45 = vld [vmem:[%s2294_s6 + $0x28] sm:$0xff]  ;;  %v807_v46 = vld [vmem:[%s2294_s6 + $0x20] sm:$0xff]  ;;  %v806_v47 = vld [vmem:[%s2294_s6 + $0x18] sm:$0xff]  ;;  %845 = vst.msk [vmem:[#allocation4] sm:$0x1] %vm844_vm9, %v1537_v4 }
  0x1c   : > { %v805_v48 = vld [vmem:[%s2294_s6 + $0x10] sm:$0xff]  ;;  %v804_v49 = vld [vmem:[%s2294_s6 + $0x8] sm:$0xff]  ;;  %v803_v50 = vld [vmem:[%s2294_s6] sm:$0xff]  ;;  %1165 = vst.msk [vmem:[#allocation7 + $0x4] sm:$0x1] %vm844_vm9, %v1537_v4 }
  0x1d   : > { %775 = vmatpush.msra.mxu0 %v750_v25  ;;  %v1515_v33 = vld [vmem:[%s2293_s23] ss:$0 sm:$0xff]  ;;  %829 = vmatpush.msra.mxu1 %v812_v41  ;;  %v880_v57 = vld [vmem:[%s2261_s7 + $0xb0] sm:$0xff]  ;;  %v879_v58 = vld [vmem:[%s2261_s7 + $0xa8] sm:$0xff] }
  0x1e   : > { %915 = vmatpush.msra.mxu3 %v880_v57  ;;  %v878_v59 = vld [vmem:[%s2261_s7 + $0xa0] sm:$0xff]  ;;  %v877_v60 = vld [vmem:[%s2261_s7 + $0x98] sm:$0xff]  ;;  %v876_v61 = vld [vmem:[%s2261_s7 + $0x90] sm:$0xff] }
  0x1f   : > { %708 = vperm.xlu0 %1512, %v1488_v3   ;;  %776 = vmatpush.msra.mxu0 %v749_v26  ;;  %v875_v62 = vld [vmem:[%s2261_s7 + $0x88] sm:$0xff]  ;;  %v874_v63 = vld [vmem:[%s2261_s7 + $0x80] sm:$0xff]  ;;  %v873_v0 = vld [vmem:[%s2261_s7 + $0x78] sm:$0xff] }
  0x20   : > { %830 = vmatpush.msra.mxu1 %v811_v42  ;;  %916 = vmatpush.msra.mxu3 %v879_v58  ;;  %v872_v1 = vld [vmem:[%s2261_s7 + $0x70] sm:$0xff]  ;;  %v871_v2 = vld [vmem:[%s2261_s7 + $0x68] sm:$0xff]  ;;  %v870_v3 = vld [vmem:[%s2261_s7 + $0x60] sm:$0xff] }
  0x21   : > { %777 = vmatpush.msra.mxu0 %v748_v27  ;;  %886 = vmatpush.msra.mxu2 %v873_v0  ;;  %v868_v6 = vld [vmem:[%s2261_s7 + $0x50] sm:$0xff]  ;;  %v858_v22 = vld [vmem:[%s2261_s7] sm:$0xff]  ;;  %v946_v23 = vld [vmem:[%s2263_s9 + $0x78] sm:$0xff] }
  0x22   : > { %831 = vmatpush.msra.mxu1 %v810_v43  ;;  %917 = vmatpush.msra.mxu3 %v878_v59  ;;  %v983_v24 = vld [vmem:[%s2264_s10 + $0x78] sm:$0xff]  ;;  %v945_v25 = vld [vmem:[%s2263_s9 + $0x70] sm:$0xff]  ;;  %v944_v26 = vld [vmem:[%s2263_s9 + $0x68] sm:$0xff] }
  0x23   : > { %887 = vmatpush.msra.mxu2 %v872_v1  ;;  %948 = vmatpush.msrb.mxu0 %v946_v23  ;;  %v982_v4 = vld [vmem:[%s2264_s10 + $0x70] sm:$0xff]  ;;  %v981_v27 = vld [vmem:[%s2264_s10 + $0x68] sm:$0xff]  ;;  %v939_v40 = vld [vmem:[%s2263_s9 + $0x40] sm:$0xff] }
  0x24   : > { %832 = vmatpush.msra.mxu1 %v809_v44  ;;  %918 = vmatpush.msra.mxu3 %v877_v60  ;;  %v977_v39 = vld [vmem:[%s2264_s10 + $0x48] sm:$0xff]  ;;  %v976_v41 = vld [vmem:[%s2264_s10 + $0x40] sm:$0xff]  ;;  %v848_v42 = vld [vmem:[#allocation4] ss:$2 sm:$0x1] }
  0x25   : > { %888 = vmatpush.msra.mxu2 %v871_v2  ;;  %949 = vmatpush.msrb.mxu0 %v945_v25  ;;  %v936_v51 = vld [vmem:[%s2263_s9 + $0x28] sm:$0xff]  ;;  %v934_v57 = vld [vmem:[%s2263_s9 + $0x18] sm:$0xff]  ;;  %v933_v60 = vld [vmem:[%s2263_s9 + $0x10] sm:$0xff] }
  0x26   : > { %833 = vmatpush.msra.mxu1 %v808_v45  ;;  %919 = vmatpush.msra.mxu3 %v876_v61  ;;  %v938_v45 = vld [vmem:[%s2263_s9 + $0x38] sm:$0xff]  ;;  %v970_v61 = vld [vmem:[%s2264_s10 + $0x10] sm:$0xff]  ;;  %v969_v0 = vld [vmem:[%s2264_s10 + $0x8] sm:$0xff] }
  0x27   : > { %889 = vmatpush.msra.mxu2 %v870_v3  ;;  %950 = vmatpush.msrb.mxu0 %v944_v26  ;;  %v971_v58 = vld [vmem:[%s2264_s10 + $0x18] sm:$0xff]  ;;  %v989_v1 = vld [vmem:[%s2264_s10 + $0xa8] sm:$0xff]  ;;  %v931_v2 = vld [vmem:[%s2263_s9] sm:$0xff] }
  0x28   : > { %834 = vmatpush.msra.mxu1 %v807_v46  ;;  %920 = vmatpush.msra.mxu3 %v875_v62  ;;  %v975_v46 = vld [vmem:[%s2264_s10 + $0x38] sm:$0xff]  ;;  %v990_v62 = vld [vmem:[%s2264_s10 + $0xb0] sm:$0xff]  ;;  %v968_v3 = vld [vmem:[%s2264_s10] sm:$0xff] }
  0x29   : > { %v991_v59 = vld [vmem:[%s2264_s10 + $0xb8] sm:$0xff] }
  0x2a   : > { %835 = vmatpush.msra.mxu1 %v806_v47  ;;  %921 = vmatpush.msra.mxu3 %v874_v63  ;;  %v995_v47 = vld [vmem:[%s2264_s10 + $0xd8] sm:$0xff]  ;;  %v932_v63 = vld [vmem:[%s2263_s9 + $0x8] sm:$0xff] }
  0x2b   : > { %v1059_v23 = vld [vmem:[%s2266_s12 + $0x58] sm:$0xff] }
  0x2c   : > { %836 = vmatpush.msra.mxu1 %v805_v48  ;;  %1000 = vmatpush.msrb.mxu3 %v983_v24  ;;  %v937_v48 = vld [vmem:[%s2263_s9 + $0x30] sm:$0xff]  ;;  %v1099_v24 = vld [vmem:[%s2267_s13 + $0x58] sm:$0xff] }
  0x2d   : > { %v1115_v25 = vld [vmem:[%s2267_s13 + $0xd8] sm:$0xff] }
  0x2e   : > { %837 = vmatpush.msra.mxu1 %v804_v49  ;;  %1001 = vmatpush.msrb.mxu3 %v982_v4  ;;  %v974_v49 = vld [vmem:[%s2264_s10 + $0x30] sm:$0xff]  ;;  %v882_v4 = vld [vmem:[%s2262_s8] sm:$0x1] }
  0x30   : > { %838 = vmatpush.msra.mxu1 %v803_v50  ;;  %1002 = vmatpush.msrb.mxu3 %v981_v27  ;;  %v994_v50 = vld [vmem:[%s2264_s10 + $0xd0] sm:$0xff] }
  0x89   : > { %v702_v5 = vpop.permute.xlu0 %701 }
  0x8a   : > { %v717_v10 = vpop.permute.xlu1 %716  ;;  %v705_v12 = vmul.f32 %v704_v7, %v702_v5  ;;  %v869_v5 = vld [vmem:[%s2261_s7 + $0x58] sm:$0xff]  ;;  %v867_v7 = vld [vmem:[%s2261_s7 + $0x48] sm:$0xff] }
  0x8b   : > { %v720_v14 = vmul.f32 %v719_v9, %v717_v10  ;;  %890 = vmatpush.msra.mxu2 %v869_v5  ;;  %v865_v9 = vld [vmem:[%s2261_s7 + $0x38] sm:$0xff]  ;;  %v1516_v10 = vld [vmem:[%s2295_s5] ss:$0 sm:$0xff] }
  0x8c   : > { %v988_v5 = vld [vmem:[%s2264_s10 + $0xa0] sm:$0xff] }
  0x8d   : > { %891 = vmatpush.msra.mxu2 %v868_v6  ;;  %v987_v6 = vld [vmem:[%s2264_s10 + $0x98] sm:$0xff] }
  0x8f   : > { %892 = vmatpush.msra.mxu2 %v867_v7  ;;  %v986_v7 = vld [vmem:[%s2264_s10 + $0x90] sm:$0xff] }
  0x91   : > { %v709_v11 = vpop.permute.xlu0 %708 }
  0x92   : > { %v712_v13 = vmul.f32 %v711_v8, %v709_v11  ;;  %v866_v8 = vld [vmem:[%s2261_s7 + $0x40] sm:$0xff]  ;;  %v864_v11 = vld [vmem:[%s2261_s7 + $0x30] sm:$0xff] }
  0x93   : > { %893 = vmatpush.msra.mxu2 %v866_v8  ;;  %v1063_v8 = vld [vmem:[%s2266_s12 + $0x78] sm:$0xff] }
  0x94   : > { %v713_v15 = vadd.f32 %v712_v13, %v705_v12  ;;  %v863_v12 = vld [vmem:[%s2261_s7 + $0x28] sm:$0xff] }
  0x95   : > { %894 = vmatpush.msra.mxu2 %v865_v9  ;;  %v1103_v9 = vld [vmem:[%s2267_s13 + $0x78] sm:$0xff] }
  0x96   : > { %v721_v17 = vadd.f32 %v720_v14, %v713_v15  ;;  %v862_v15 = vld [vmem:[%s2261_s7 + $0x20] sm:$0xff] }
  0x97   : > { %895 = vmatpush.msra.mxu2 %v864_v11  ;;  %v1062_v11 = vld [vmem:[%s2266_s12 + $0x70] sm:$0xff] }
  0x98   : > { %v726_v18 = vadd.f32 %v1514_v16, %v721_v17  ;;  %v861_v17 = vld [vmem:[%s2261_s7 + $0x18] sm:$0xff] }
  0x99   : > { %896 = vmatpush.msra.mxu2 %v863_v12  ;;  %v1102_v12 = vld [vmem:[%s2267_s13 + $0x70] sm:$0xff] }
  0x9a   : > { %v727_v19 = vmax.f32 %v726_v18, 0.0  ;;  %v860_v18 = vld [vmem:[%s2261_s7 + $0x10] sm:$0xff] }
  0x9b   : > { %897 = vmatpush.msra.mxu2 %v862_v15  ;;  %v985_v15 = vld [vmem:[%s2264_s10 + $0x88] sm:$0xff] }
  0x9c   : > { %731 = vst.msk [vmem:[#allocation2 + $0x1] sm:$0xff] %vm730_vm1, %v727_v19  ;;  %v859_v19 = vld [vmem:[%s2261_s7 + $0x8] sm:$0xff] }
  0x9d   : > { %898 = vmatpush.msra.mxu2 %v861_v17  ;;  %v1117_v17 = vld [vmem:[%s2267_s13 + $0xe8] sm:$0xff] }
  0x9f   : > { %899 = vmatpush.msra.mxu2 %v860_v18  ;;  %v1060_v18 = vld [vmem:[%s2266_s12 + $0x60] sm:$0xff] }
  0xa1   : > { %900 = vmatpush.msra.mxu2 %v859_v19  ;;  %v984_v19 = vld [vmem:[%s2264_s10 + $0x80] sm:$0xff] }
  0xa3   : > { %v736_v20 = vld [vmem:[#allocation2 + $0x2] ss:$2 sm:$0xf]  ;;  %v734_v21 = vld [vmem:[#allocation2 + $0x1] ss:$2 sm:$0xf]  ;;  %901 = vmatpush.msra.mxu2 %v858_v22 }
  0xa4   : > { %742 = vrot.lane.b32.xlu2 %v736_v20, %s2279_s2  ;;  %738 = vrot.lane.b32.xlu1 %v734_v21, %s1539_s27  ;;  %v732_v29 = vld [vmem:[#allocation2] ss:$2 sm:$0xf] }
  0xa5   : > { %1068 = vmatpush.msrb.mxu2 %v1063_v8  ;;  %v1116_v22 = vld [vmem:[%s2267_s13 + $0xe0] sm:$0xff] }
  0xa7   : > { %1069 = vmatpush.msrb.mxu2 %v1062_v11 }
  0xfe   : > { %v743_v30 = vpop.permute.xlu2 %742 }
 0x116   : > { %v739_v28 = vpop.permute.xlu1 %738 }
 0x117   : > { %v745_v31 = vsel %vm730_vm1, %v732_v29, %v739_v28  ;;  %v999_v28 = vld [vmem:[%s2264_s10 + $0xf8] sm:$0xff]  ;;  %v943_v29 = vld [vmem:[%s2263_s9 + $0x60] sm:$0xff] }
 0x118   : > { %v747_v32 = vsel %vm746_vm2, %v745_v31, %v743_v30  ;;  %v980_v30 = vld [vmem:[%s2264_s10 + $0x60] sm:$0xff]  ;;  %1020 = vmatpush.msrb.mxu1 %v999_v28  ;;  %v998_v31 = vld [vmem:[%s2264_s10 + $0xf0] sm:$0xff]  ;;  %951 = vmatpush.msrb.mxu0 %v943_v29 }
 0x119   : > { %1490 = vmatmul.msk.f32.vlgmr.msra.gmra.mxu0 %vm758_vm3, %v747_v32  ;;  %v997_v32 = vld [vmem:[%s2264_s10 + $0xe8] sm:$0xff]  ;;  %1003 = vmatpush.msrb.mxu3 %v980_v30 }
 0x11a   : > { %1021 = vmatpush.msrb.mxu1 %v998_v31 }
 0x11c   : > { %1022 = vmatpush.msrb.mxu1 %v997_v32  ;;  %v1058_v32 = vld [vmem:[%s2266_s12 + $0x50] sm:$0xff] }
 0x196   : > { %v779_v34 = vpop.f32.mrf.mxu0 }
 0x197   : > { %v780_v35 = vadd.f32 %v1515_v33, %v779_v34  ;;  %v942_v33 = vld [vmem:[%s2263_s9 + $0x58] sm:$0xff] }
 0x198   : > { %v979_v34 = vld [vmem:[%s2264_s10 + $0x58] sm:$0xff]  ;;  %952 = vmatpush.msrb.mxu0 %v942_v33  ;;  %v1098_v33 = vld [vmem:[%s2267_s13 + $0x50] sm:$0xff] }
 0x199   : > { %v782_v36 = vmax.f32 %v780_v35, 0.0  ;;  %v996_v35 = vld [vmem:[%s2264_s10 + $0xe0] sm:$0xff]  ;;  %1004 = vmatpush.msrb.mxu3 %v979_v34  ;;  %v1114_v34 = vld [vmem:[%s2267_s13 + $0xd0] sm:$0xff] }
 0x19a   : > { %1023 = vmatpush.msrb.mxu1 %v996_v35  ;;  %v1057_v35 = vld [vmem:[%s2266_s12 + $0x48] sm:$0xff] }
 0x19b   : > { %786 = vst.msk [vmem:[#allocation3 + $0x1] sm:$0xf] %vm785_vm5, %v782_v36  ;;  %v941_v36 = vld [vmem:[%s2263_s9 + $0x50] sm:$0xff] }
 0x19c   : > { %953 = vmatpush.msrb.mxu0 %v941_v36  ;;  %1024 = vmatpush.msrb.mxu1 %v995_v47  ;;  %v1097_v36 = vld [vmem:[%s2267_s13 + $0x48] sm:$0xff] }
 0x19d   : > { %v1053_v47 = vld [vmem:[%s2266_s12 + $0x28] sm:$0xff] }
 0x19e   : > { %1025 = vmatpush.msrb.mxu1 %v994_v50  ;;  %v1052_v50 = vld [vmem:[%s2266_s12 + $0x20] sm:$0xff] }
 0x1a2   : > { %v791_v37 = vld [vmem:[#allocation3 + $0x2] ss:$2 sm:$0x3]  ;;  %v789_v38 = vld [vmem:[#allocation3 + $0x1] ss:$2 sm:$0x3] }
 0x1a3   : > { %797 = vrot.lane.b32.xlu0 %v791_v37, %s2280_s1  ;;  %793 = vrot.lane.b32.xlu2 %v789_v38, %s2279_s2  ;;  %v787_v53 = vld [vmem:[#allocation3] ss:$2 sm:$0x3]  ;;  %v940_v38 = vld [vmem:[%s2263_s9 + $0x48] sm:$0xff]  ;;  %s688_s2 = scalar_lea.vmem %s2275_s21, %s1486_s30 }
 0x1a4   : > { %v978_v37 = vld [vmem:[%s2264_s10 + $0x50] sm:$0xff]  ;;  %954 = vmatpush.msrb.mxu0 %v940_v38  ;;  %v1056_v38 = vld [vmem:[%s2266_s12 + $0x40] sm:$0xff] }
 0x1a5   : > { %1005 = vmatpush.msrb.mxu3 %v978_v37  ;;  %v1113_v37 = vld [vmem:[%s2267_s13 + $0xc8] sm:$0xff] }
 0x1a6   : > { %955 = vmatpush.msrb.mxu0 %v939_v40  ;;  %v1112_v40 = vld [vmem:[%s2267_s13 + $0xc0] sm:$0xff] }
 0x1a7   : > { %1006 = vmatpush.msrb.mxu3 %v977_v39  ;;  %v1096_v39 = vld [vmem:[%s2267_s13 + $0x40] sm:$0xff] }
 0x1a8   : > { %956 = vmatpush.msrb.mxu0 %v938_v45  ;;  %v1094_v45 = vld [vmem:[%s2267_s13 + $0x30] sm:$0xff] }
 0x1a9   : > { %1007 = vmatpush.msrb.mxu3 %v976_v41  ;;  %v1055_v41 = vld [vmem:[%s2266_s12 + $0x38] sm:$0xff] }
 0x1aa   : > { %957 = vmatpush.msrb.mxu0 %v937_v48  ;;  %v1093_v48 = vld [vmem:[%s2267_s13 + $0x28] sm:$0xff] }
 0x1ab   : > { %1008 = vmatpush.msrb.mxu3 %v975_v46  ;;  %v1110_v46 = vld [vmem:[%s2267_s13 + $0xb0] sm:$0xff] }
 0x1ac   : > { %958 = vmatpush.msrb.mxu0 %v936_v51  ;;  %v1092_v51 = vld [vmem:[%s2267_s13 + $0x20] sm:$0xff] }
 0x1ad   : > { %1009 = vmatpush.msrb.mxu3 %v974_v49  ;;  %v1109_v49 = vld [vmem:[%s2267_s13 + $0xa8] sm:$0xff] }
 0x1fd   : > { %v794_v52 = vpop.permute.xlu2 %793 }
 0x1fe   : > { %v800_v54 = vsel %vm746_vm2, %v787_v53, %v794_v52  ;;  %v973_v52 = vld [vmem:[%s2264_s10 + $0x28] sm:$0xff] }
 0x1ff   : > { %v993_v53 = vld [vmem:[%s2264_s10 + $0xc8] sm:$0xff]  ;;  %1010 = vmatpush.msrb.mxu3 %v973_v52  ;;  %v1108_v52 = vld [vmem:[%s2267_s13 + $0xa0] sm:$0xff] }
 0x200   : > { %1026 = vmatpush.msrb.mxu1 %v993_v53  ;;  %v1051_v53 = vld [vmem:[%s2266_s12 + $0x18] sm:$0xff] }
 0x215   : > { %v798_v55 = vpop.permute.xlu0 %797 }
 0x216   : > { %v802_v56 = vsel %vm801_vm6, %v800_v54, %v798_v55  ;;  %v935_v54 = vld [vmem:[%s2263_s9 + $0x20] sm:$0xff] }
 0x217   : > { %1491 = vmatmul.msk.f32.vlgmr.msra.gmra.mxu1 %vm819_vm7, %v802_v56  ;;  %v972_v55 = vld [vmem:[%s2264_s10 + $0x20] sm:$0xff]  ;;  %959 = vmatpush.msrb.mxu0 %v935_v54  ;;  %v1091_v54 = vld [vmem:[%s2267_s13 + $0x18] sm:$0xff] }
 0x218   : > { %v992_v56 = vld [vmem:[%s2264_s10 + $0xc0] sm:$0xff]  ;;  %1011 = vmatpush.msrb.mxu3 %v972_v55  ;;  %v1107_v55 = vld [vmem:[%s2267_s13 + $0x98] sm:$0xff] }
 0x219   : > { %1027 = vmatpush.msrb.mxu1 %v992_v56  ;;  %960 = vmatpush.msrb.mxu0 %v934_v57  ;;  %v1050_v56 = vld [vmem:[%s2266_s12 + $0x10] sm:$0xff] }
 0x21a   : > { %1012 = vmatpush.msrb.mxu3 %v971_v58  ;;  %v1090_v57 = vld [vmem:[%s2267_s13 + $0x10] sm:$0xff] }
 0x21b   : > { %1028 = vmatpush.msrb.mxu1 %v991_v59  ;;  %961 = vmatpush.msrb.mxu0 %v933_v60  ;;  %v1106_v58 = vld [vmem:[%s2267_s13 + $0x90] sm:$0xff]  ;;  %v1049_v59 = vld [vmem:[%s2266_s12 + $0x8] sm:$0xff] }
 0x21c   : > { %1013 = vmatpush.msrb.mxu3 %v970_v61  ;;  %v1089_v60 = vld [vmem:[%s2267_s13 + $0x8] sm:$0xff] }
 0x21d   : > { %1029 = vmatpush.msrb.mxu1 %v990_v62  ;;  %962 = vmatpush.msrb.mxu0 %v932_v63  ;;  %v1105_v61 = vld [vmem:[%s2267_s13 + $0x88] sm:$0xff]  ;;  %v1048_v62 = vld [vmem:[%s2266_s12] sm:$0xff] }
 0x21e   : > { %1014 = vmatpush.msrb.mxu3 %v969_v0  ;;  %v1088_v63 = vld [vmem:[%s2267_s13] sm:$0xff] }
 0x21f   : > { %1030 = vmatpush.msrb.mxu1 %v989_v1  ;;  %963 = vmatpush.msrb.mxu0 %v931_v2  ;;  %v1104_v0 = vld [vmem:[%s2267_s13 + $0x80] sm:$0xff] }
 0x220   : > { %1015 = vmatpush.msrb.mxu3 %v968_v3  ;;  %v947_v1 = vld [vmem:[%s2265_s11] sm:$0x1] }
 0x221   : > { %1031 = vmatpush.msrb.mxu1 %v988_v5  ;;  %1120 = vmatpush.msra.mxu0 %v1103_v9 }
 0x223   : > { %1032 = vmatpush.msrb.mxu1 %v987_v6  ;;  %1121 = vmatpush.msra.mxu0 %v1102_v12 }
 0x225   : > { %1033 = vmatpush.msrb.mxu1 %v986_v7 }
 0x227   : > { %1034 = vmatpush.msrb.mxu1 %v985_v15  ;;  %v1173_v15 = vld [vmem:[%s2269_s15 + $0x28] sm:$0xff] }
 0x229   : > { %1035 = vmatpush.msrb.mxu1 %v984_v19  ;;  %v1169_v19 = vld [vmem:[%s2269_s15 + $0x8] sm:$0xff] }
 0x294   : > { %v840_v13 = vpop.f32.mrf.mxu1 }
 0x295   : > { %v841_v14 = vadd.f32 %v1516_v10, %v840_v13  ;;  %v1119_v10 = vld [vmem:[%s2267_s13 + $0xf8] sm:$0xff]  ;;  %v1118_v13 = vld [vmem:[%s2267_s13 + $0xf0] sm:$0xff] }
 0x297   : > { %v843_v16 = vmax.f32 %v841_v14, 0.0  ;;  %v1061_v14 = vld [vmem:[%s2266_s12 + $0x68] sm:$0xff] }
 0x298   : > { %1070 = vmatpush.msrb.mxu2 %v1061_v14  ;;  %v1174_v14 = vld [vmem:[%s2269_s15 + $0x30] sm:$0xff] }
 0x299   : > { %847 = vst.msk [vmem:[#allocation4 + $0x1] sm:$0x3] %vm846_vm8, %v843_v16  ;;  %v1101_v16 = vld [vmem:[%s2267_s13 + $0x68] sm:$0xff] }
 0x29a   : > { %1122 = vmatpush.msra.mxu0 %v1101_v16  ;;  %1071 = vmatpush.msrb.mxu2 %v1060_v18  ;;  %v1172_v16 = vld [vmem:[%s2269_s15 + $0x20] sm:$0xff]  ;;  %v1170_v18 = vld [vmem:[%s2269_s15 + $0x10] sm:$0xff] }
 0x29c   : > { %1072 = vmatpush.msrb.mxu2 %v1059_v23  ;;  %v1221_v23 = vld [vmem:[%s2270_s16 + $0x68] sm:$0xff] }
 0x29e   : > { %1073 = vmatpush.msrb.mxu2 %v1058_v32 }
 0x2a0   : > { %v852_v20 = vld [vmem:[#allocation4 + $0x2] ss:$2 sm:$0x1]  ;;  %v850_v21 = vld [vmem:[#allocation4 + $0x1] ss:$2 sm:$0x1]  ;;  %1074 = vmatpush.msrb.mxu2 %v1057_v35 }
 0x2a1   : > { %1492 = vmatmul.msk.f32.vlgmr.msra.gmra.mxu3 %vm801_vm6, %v852_v20  ;;  %854 = vrot.lane.b32.xlu1 %v850_v21, %s2296_s24  ;;  %v1100_v20 = vld [vmem:[%s2267_s13 + $0x60] sm:$0xff]  ;;  %v930_v21 = vld [vmem:[#allocation5 + $0x1] sm:$0x1] }
 0x2a2   : > { %1140 = vmatpush.msra.mxu3 %v1119_v10  ;;  %1123 = vmatpush.msra.mxu0 %v1100_v20  ;;  %v1168_v20 = vld [vmem:[%s2269_s15] sm:$0xff] }
 0x2a3   : > { %1036 = vmatmul.f32.vlgmr.msrb.gmra.mxu1 %v930_v21  ;;  %1075 = vmatpush.msrb.mxu2 %v1056_v38  ;;  %v1223_v21 = vld [vmem:[%s2270_s16 + $0x78] sm:$0xff]  ;;  %v1212_v38 = vld [vmem:[%s2270_s16 + $0x20] sm:$0xff] }
 0x2a4   : > { %1141 = vmatpush.msra.mxu3 %v1118_v13  ;;  %1124 = vmatpush.msra.mxu0 %v1099_v24  ;;  %v1175_v13 = vld [vmem:[%s2269_s15 + $0x38] sm:$0xff]  ;;  %v1220_v24 = vld [vmem:[%s2270_s16 + $0x60] sm:$0xff] }
 0x2a5   : > { %1076 = vmatpush.msrb.mxu2 %v1055_v41  ;;  %1191 = vmatpush.msra.mxu1 %v1175_v13  ;;  %v1211_v41 = vld [vmem:[%s2270_s16 + $0x18] sm:$0xff] }
 0x2a6   : > { %1142 = vmatpush.msra.mxu3 %v1117_v17  ;;  %1125 = vmatpush.msra.mxu0 %v1098_v33  ;;  %v1171_v17 = vld [vmem:[%s2269_s15 + $0x18] sm:$0xff] }
 0x2a7   : > { %1192 = vmatpush.msra.mxu1 %v1174_v14 }
 0x2a8   : > { %1143 = vmatpush.msra.mxu3 %v1116_v22  ;;  %1126 = vmatpush.msra.mxu0 %v1097_v36  ;;  %v1222_v22 = vld [vmem:[%s2270_s16 + $0x70] sm:$0xff] }
 0x2a9   : > { %1193 = vmatpush.msra.mxu1 %v1173_v15 }
 0x2aa   : > { %1144 = vmatpush.msra.mxu3 %v1115_v25  ;;  %1127 = vmatpush.msra.mxu0 %v1096_v39  ;;  %v1219_v25 = vld [vmem:[%s2270_s16 + $0x58] sm:$0xff] }
 0x2ab   : > { %1194 = vmatpush.msra.mxu1 %v1172_v16 }
 0x2ac   : > { %1145 = vmatpush.msra.mxu3 %v1114_v34  ;;  %v1213_v34 = vld [vmem:[%s2270_s16 + $0x28] sm:$0xff] }
 0x2ad   : > { %1195 = vmatpush.msra.mxu1 %v1171_v17 }
 0x2ae   : > { %1146 = vmatpush.msra.mxu3 %v1113_v37 }
 0x2af   : > { %1196 = vmatpush.msra.mxu1 %v1170_v18 }
 0x2b0   : > { %1147 = vmatpush.msra.mxu3 %v1112_v40 }
 0x2b1   : > { %1197 = vmatpush.msra.mxu1 %v1169_v19 }
 0x2b3   : > { %1198 = vmatpush.msra.mxu1 %v1168_v20 }
 0x313   : > { %v855_v43 = vpop.permute.xlu1 %854 }
 0x314   : > { %v857_v44 = vsel %vm801_vm6, %v848_v42, %v855_v43  ;;  %v1095_v42 = vld [vmem:[%s2267_s13 + $0x38] sm:$0xff] }
 0x315   : > { %902 = vmatmul.f32.vlgmr.msra.gmra.mxu2 %v857_v44  ;;  %v1111_v43 = vld [vmem:[%s2267_s13 + $0xb8] sm:$0xff]  ;;  %1128 = vmatpush.msra.mxu0 %v1095_v42  ;;  %v1054_v44 = vld [vmem:[%s2266_s12 + $0x30] sm:$0xff] }
 0x316   : > { %1148 = vmatpush.msra.mxu3 %v1111_v43  ;;  %1077 = vmatpush.msrb.mxu2 %v1054_v44  ;;  %v1210_v42 = vld [vmem:[%s2270_s16 + $0x10] sm:$0xff]  ;;  %v1209_v43 = vld [vmem:[%s2270_s16 + $0x8] sm:$0xff] }
 0x317   : > { %1129 = vmatpush.msra.mxu0 %v1094_v45 }
 0x318   : > { %1149 = vmatpush.msra.mxu3 %v1110_v46  ;;  %1078 = vmatpush.msrb.mxu2 %v1053_v47  ;;  %v1208_v46 = vld [vmem:[%s2270_s16] sm:$0xff] }
 0x319   : > { %1130 = vmatpush.msra.mxu0 %v1093_v48 }
 0x31a   : > { %1150 = vmatpush.msra.mxu3 %v1109_v49  ;;  %1079 = vmatpush.msrb.mxu2 %v1052_v50  ;;  %v1518_v49 = vld [vmem:[%s2271_s17] ss:$0 sm:$0xff] }
 0x31b   : > { %1131 = vmatpush.msra.mxu0 %v1092_v51 }
 0x31c   : > { %1151 = vmatpush.msra.mxu3 %v1108_v52  ;;  %1080 = vmatpush.msrb.mxu2 %v1051_v53  ;;  %v1255_v53 = vld [vmem:[%s2272_s18 + $0x18] sm:$0xff] }
 0x31d   : > { %1132 = vmatpush.msra.mxu0 %v1091_v54  ;;  %v1254_v54 = vld [vmem:[%s2272_s18 + $0x10] sm:$0xff]  ;;  %1275 = vmatpush.msrb.mxu1 %v1255_v53 }
 0x31e   : > { %1152 = vmatpush.msra.mxu3 %v1107_v55  ;;  %1081 = vmatpush.msrb.mxu2 %v1050_v56  ;;  %v1253_v55 = vld [vmem:[%s2272_s18 + $0x8] sm:$0xff]  ;;  %v1252_v56 = vld [vmem:[%s2272_s18] sm:$0xff] }
 0x31f   : > { %1133 = vmatpush.msra.mxu0 %v1090_v57  ;;  %1276 = vmatpush.msrb.mxu1 %v1254_v54  ;;  %v1295_v57 = vld [vmem:[%s2273_s19 + $0x38] sm:$0xff] }
 0x320   : > { %1153 = vmatpush.msra.mxu3 %v1106_v58  ;;  %1082 = vmatpush.msrb.mxu2 %v1049_v59  ;;  %v1037_v7 = vpop.f32.mrf.mxu1  ;;  %v1294_v58 = vld [vmem:[%s2273_s19 + $0x30] sm:$0xff]  ;;  %v1293_v59 = vld [vmem:[%s2273_s19 + $0x28] sm:$0xff] }
 0x321   : > { %1134 = vmatpush.msra.mxu0 %v1089_v60  ;;  %1277 = vmatpush.msrb.mxu1 %v1253_v55  ;;  %v1292_v60 = vld [vmem:[%s2273_s19 + $0x20] sm:$0xff] }
 0x322   : > { %1154 = vmatpush.msra.mxu3 %v1105_v61  ;;  %1083 = vmatpush.msrb.mxu2 %v1048_v62  ;;  %v1291_v61 = vld [vmem:[%s2273_s19 + $0x18] sm:$0xff]  ;;  %v1290_v62 = vld [vmem:[%s2273_s19 + $0x10] sm:$0xff] }
 0x323   : > { %1135 = vmatpush.msra.mxu0 %v1088_v63  ;;  %1278 = vmatpush.msrb.mxu1 %v1252_v56  ;;  %v1289_v63 = vld [vmem:[%s2273_s19 + $0x8] sm:$0xff] }
 0x324   : > { %v923_v28 = vpop.f32.mrf.mxu3  ;;  %1155 = vmatpush.msra.mxu3 %v1104_v0  ;;  %1224 = vmatpush.msra.mxu2 %v1223_v21 }
 0x326   : > { %1225 = vmatpush.msra.mxu2 %v1222_v22 }
 0x328   : > { %1226 = vmatpush.msra.mxu2 %v1221_v23 }
 0x32a   : > { %1227 = vmatpush.msra.mxu2 %v1220_v24 }
 0x32c   : > { %1228 = vmatpush.msra.mxu2 %v1219_v25 }
 0x398   : > { %v903_v26 = vpop.f32.mrf.mxu2 }
 0x399   : > { %v904_v27 = vadd.f32 %v903_v26, %v882_v4  ;;  %v1218_v4 = vld [vmem:[%s2270_s16 + $0x50] sm:$0xff]  ;;  %v1217_v26 = vld [vmem:[%s2270_s16 + $0x48] sm:$0xff] }
 0x39a   : > { %1229 = vmatpush.msra.mxu2 %v1218_v4 }
 0x39b   : > { %v924_v29 = vadd.f32 %v923_v28, %v904_v27  ;;  %v1216_v27 = vld [vmem:[%s2270_s16 + $0x40] sm:$0xff] }
 0x39c   : > { %1230 = vmatpush.msra.mxu2 %v1217_v26  ;;  %v1517_v28 = vld [vmem:[%s2268_s14] ss:$0 sm:$0xff] }
 0x39d   : > { %v926_v30 = vmax.f32 %v924_v29, 0.0  ;;  %v1215_v29 = vld [vmem:[%s2270_s16 + $0x38] sm:$0xff] }
 0x39e   : > { %1231 = vmatpush.msra.mxu2 %v1216_v27 }
 0x39f   : > { %927 = vst [vmem:[#allocation5] sm:$0x1] %v926_v30 }
 0x3a0   : > { %1232 = vmatpush.msra.mxu2 %v1215_v29 }
 0x3a6   : > { %v929_v31 = vld [vmem:[#allocation5] sm:$0x1] }
 0x3a7   : > { %964 = vmatmul.f32.vlgmr.msrb.gmra.mxu0 %v929_v31  ;;  %1016 = vmatmul.f32.vlgmr.msrb.gmra.mxu3 %v929_v31  ;;  %v1214_v31 = vld [vmem:[%s2270_s16 + $0x30] sm:$0xff] }
 0x3a8   : > { %1233 = vmatpush.msra.mxu2 %v1214_v31  ;;  %1307 = vmatpush.msrb.mxu0 %v1295_v57 }
 0x3aa   : > { %1234 = vmatpush.msra.mxu2 %v1213_v34  ;;  %1308 = vmatpush.msrb.mxu0 %v1294_v58 }
 0x3ac   : > { %1235 = vmatpush.msra.mxu2 %v1212_v38  ;;  %1309 = vmatpush.msrb.mxu0 %v1293_v59 }
 0x3ae   : > { %1236 = vmatpush.msra.mxu2 %v1211_v41  ;;  %1310 = vmatpush.msrb.mxu0 %v1292_v60 }
 0x3b0   : > { %1237 = vmatpush.msra.mxu2 %v1210_v42  ;;  %1311 = vmatpush.msrb.mxu0 %v1291_v61 }
 0x3b2   : > { %1238 = vmatpush.msra.mxu2 %v1209_v43  ;;  %1312 = vmatpush.msrb.mxu0 %v1290_v62 }
 0x3b4   : > { %1239 = vmatpush.msra.mxu2 %v1208_v46  ;;  %1313 = vmatpush.msrb.mxu0 %v1289_v63 }
 0x424   : > { %v965_v2 = vpop.f32.mrf.mxu0 }
 0x425   : > { %v966_v3 = vadd.f32 %v965_v2, %v947_v1 }
 0x427   : > { %v1040_v5 = vmax.f32 %v966_v3, 0.0 }
 0x429   : > { %1042 = vst [vmem:[#allocation6] ss:$2 sm:$0x1] %v1040_v5 }
 0x42a   : > { %v1017_v6 = vpop.f32.mrf.mxu3 }
 0x42b   : > { %v1018_v8 = vadd.f32 %v1017_v6, %v947_v1  ;;  %v1288_v6 = vld [vmem:[%s2273_s19] sm:$0xff] }
 0x42c   : > { %1314 = vmatpush.msrb.mxu0 %v1288_v6 }
 0x42d   : > { %v1038_v9 = vadd.f32 %v1037_v7, %v1018_v8 }
 0x42f   : > { %v1041_v10 = vmax.f32 %v1038_v9, 0.0  ;;  %v1519_v9 = vld [vmem:[%s2274_s20] ss:$0 sm:$0xff] }
 0x431   : > { %1044 = vst [vmem:[#allocation6 + $0x1] ss:$2 sm:$0x1] %v1041_v10 }
 0x438   : > { %v1046_v11 = vld [vmem:[#allocation6] sm:$0x3] }
 0x439   : > { %v1047_v12 = vld [vmem:[#allocation6 + $0x1] sm:$0x3]  ;;  %1084 = vmatmul.f32.vlgmr.msrb.gmra.mxu2 %v1046_v11  ;;  %1136 = vmatmul.f32.vlgmr.msra.gmra.mxu0 %v1046_v11 }
 0x43a   : > { %1156 = vmatmul.f32.vlgmr.msra.gmra.mxu3 %v1047_v12 }
 0x4b6   : > { %v1137_v30 = vpop.f32.mrf.mxu0 }
 0x4b7   : > { %v1138_v32 = vadd.f32 %v1517_v28, %v1137_v30 }
 0x4bc   : > { %v1085_v33 = vpop.f32.mrf.mxu2 }
 0x4bd   : > { %v1086_v35 = vadd.f32 %v1517_v28, %v1085_v33  ;;  %v1157_v36 = vpop.f32.mrf.mxu3 }
 0x4be   : > { %v1158_v37 = vadd.f32 %v1157_v36, %v1138_v32 }
 0x4bf   : > { %v1160_v39 = vmax.f32 %v1086_v35, 0.0 }
 0x4c0   : > { %v1161_v40 = vmax.f32 %v1158_v37, 0.0 }
 0x4c1   : > { %1162 = vst [vmem:[#allocation7] ss:$2 sm:$0x3] %v1160_v39 }
 0x4c2   : > { %1164 = vst [vmem:[#allocation7 + $0x1] ss:$2 sm:$0x3] %v1161_v40 }
 0x4c9   : > { %v1167_v44 = vld [vmem:[#allocation7 + $0x1] sm:$0xf] }
 0x4ca   : > { %v1166_v45 = vld [vmem:[#allocation7] sm:$0xf]  ;;  %1204 = vrot.lane.b32.xlu2 %v1167_v44, %s2296_s24  ;;  %s2297_s24 = smov 32  }
 0x4cb   : > { %1493 = vmatmul.msk.f32.vlgmr.msra.gmra.mxu1 %vm801_vm6, %v1166_v45 }
 0x524   : > { %v1205_v47 = vpop.permute.xlu2 %1204 }
 0x525   : > { %v1207_v48 = vsel %vm801_vm6, %v1166_v45, %v1205_v47 }
 0x526   : > { %1240 = vmatmul.f32.vlgmr.msra.gmra.mxu2 %v1207_v48 }
 0x548   : > { %v1200_v50 = vpop.f32.mrf.mxu1 }
 0x549   : > { %v1201_v51 = vadd.f32 %v1518_v49, %v1200_v50 }
 0x54b   : > { %v1244_v52 = vmax.f32 %v1201_v51, 0.0 }
 0x54d   : > { %1246 = vst [vmem:[#allocation8] ss:$2 sm:$0xf] %v1244_v52 }
 0x5a9   : > { %v1241_v0 = vpop.f32.mrf.mxu2 }
 0x5aa   : > { %v1242_v1 = vadd.f32 %v1518_v49, %v1241_v0 }
 0x5ac   : > { %v1245_v2 = vmax.f32 %v1242_v1, 0.0 }
 0x5ae   : > { %1248 = vst [vmem:[#allocation8 + $0x1] ss:$2 sm:$0xf] %v1245_v2 }
 0x5b5   : > { %v1251_v3 = vld [vmem:[#allocation8 + $0x1] sm:$0xff] }
 0x5b6   : > { %v1250_v5 = vld [vmem:[#allocation8] sm:$0xff]  ;;  %1284 = vrot.lane.b32.xlu0 %v1251_v3, %s2297_s24  ;;  %s692_s24 = scalar_lea.vmem %s2276_s22, %s1486_s30 }
 0x5b7   : > { %1494 = vmatmul.msk.f32.vlgmr.msrb.gmra.mxu1 %vm746_vm2, %v1250_v5 }
 0x628   : > { %v1285_v7 = vpop.permute.xlu0 %1284 }
 0x629   : > { %v1287_v8 = vsel %vm746_vm2, %v1250_v5, %v1285_v7 }
 0x62a   : > { %1495 = vmatmul.msk.f32.vlgmr.msrb.gmra.mxu0 %vm801_vm6, %v1287_v8 }
 0x634   : > { %v1280_v10 = vpop.f32.mrf.mxu1 }
 0x635   : > { %v1281_v11 = vadd.f32 %v1519_v9, %v1280_v10 }
 0x637   : > { %v1319_v12 = vsub.f32 0.0, %v1281_v11 }
 0x639   : > { %v1320_v13 = vmul.f32 1.442695, %v1319_v12 }
 0x63b   : > { %1520 = vpow2.f32 %v1320_v13 }
 0x641   : > { %v1521_v14 = vpop.eup %1520 }
 0x642   : > { %v1322_v15 = vadd.f32 1.0, %v1521_v14 }
 0x644   : > { %1522 = vrcp.f32 %v1322_v15 }
 0x64a   : > { %v1523_v16 = vpop.eup %1522 }
 0x64b   : > { %1329 = vxpose.xlu1.b32.start.end [1/1] (short) (narrow) %v1523_v16, 8 }
 0x6a7   : > { %v1316_v17 = vpop.f32.mrf.mxu0 }
 0x6a8   : > { %v1317_v18 = vadd.f32 %v1519_v9, %v1316_v17 }
 0x6aa   : > { %v1324_v19 = vsub.f32 0.0, %v1317_v18 }
 0x6ac   : > { %v1325_v20 = vmul.f32 1.442695, %v1324_v19 }
 0x6ae   : > { %1524 = vpow2.f32 %v1325_v20 }
 0x6b4   : > { %v1525_v21 = vpop.eup %1524 }
 0x6b5   : > { %v1327_v22 = vadd.f32 1.0, %v1525_v21 }
 0x6b7   : > { %1526 = vrcp.f32 %v1327_v22 }
 0x6bd   : > { %v1527_v23 = vpop.eup %1526 }
 0x6be   : > { %1363 = vxpose.xlu2.b32.start.end [1/1] (short) (narrow) %v1527_v23, 8 }
 0x6ef   : > { %v1345_v24 = vpop.trf.xlu1 }
 0x6f0   : > { %1362 = vst.msk [vmem:[%s688_s2] sm:$0x3] %vm1361_vm10, %v1345_v24 }
 0x757   : > { %v1379_v25 = vpop.trf.xlu2 }
 0x758   : > { %1395 = vst.msk [vmem:[%s692_s24] sm:$0x3] %vm1361_vm10, %v1379_v25 }
 0x759 PF: > { %s33_s3 = sadd.s32 1, %s1534_s3  }
 0x75a   : > { %p30_p4 = scmp.ge.s32.totalorder %s33_s3, 4  }
 0x75c   :  { %32 = sbr.rel (!%p30_p4) target bundleno = 8 (0x8), region = 157 }

</bundles_post_ra>
